<compile_context>
chip_gen: v5e
topology: v5e:2x2
jax: 0.10.0
libtpu: 0.0.40
codegen_flags: <defaults>
</compile_context>

<pallas_src>
import functools

import jax
import jax.numpy as jnp
from jax import lax
from jax.experimental import pallas as pl
from jax.experimental.pallas import tpu as pltpu


# -----------------------------------------------------------------------------
# Fused Pallas kernel (both layers, both directions, FC head)
# -----------------------------------------------------------------------------
def _make_fused_bilstm_kernel(B, T, D, H, C, num_layers):
    G = 4 * H       # gate width per direction (i, f, g, o) -> 128 lanes at H=32
    B2 = 2 * B      # direction-stacked sublane count

    def kernel(*refs):
        # refs = (x, [wih_m, whh_m, b_m] * num_layers, w_fc, b_fc, out)
        x_ref = refs[0]
        lstm_refs = refs[1:1 + 3 * num_layers]
        wfc_ref = refs[1 + 3 * num_layers]
        bfc_ref = refs[2 + 3 * num_layers]
        o_ref = refs[3 + 3 * num_layers]

        f32 = jnp.float32

        # ---- hoisted constants (compiler constant-folds these) --------------
        # mask2: (2B, 2H) -> forward rows keep lanes [0,H), reverse rows keep
        # lanes [H,2H); used to build the padded LHS of the merged matmul.
        row_ids = lax.broadcasted_iota(jnp.int32, (B2, H), 0)
        mask_fwd = (row_ids < B).astype(f32)
        mask2 = jnp.concatenate([mask_fwd, 1.0 - mask_fwd], axis=1)     # (2B, 2H)
        # gate_scale: 2.0 on the g-gate lanes [2H,3H), 1.0 elsewhere, so that
        # sigmoid(2*g) can replace tanh(g) via tanh(x) = 2*sigmoid(2x) - 1.
        lane_ids = lax.broadcasted_iota(jnp.int32, (B2, G), 1)
        gate_scale = jnp.where((lane_ids >= 2 * H) & (lane_ids < 3 * H),
                               2.0, 1.0).astype(f32)                    # (2B, 4H)

        # Layer-0 input: time-major rows, row = t*B + b.
        layer_in = x_ref[...]

        last = None
        for layer in range(num_layers):
            wih_m, whh_m, b_m = lstm_refs[3 * layer:3 * layer + 3]
            wih_v = wih_m[...]          # (d_in, 8H)   [fwd | rev] lanes
            whh_v = whh_m[...]          # (2H, 4H)     vstack(whh_f, whh_r)
            b_v = b_m[...]              # (1, 8H)

            # Input projection for BOTH directions in one batched matmul.
            xp = jnp.dot(layer_in, wih_v,
                         preferred_element_type=f32) + b_v              # (T*B, 8H)
            xp_f = xp[:, :G]
            xp_r = xp[:, G:]

            # Per-step direction-stacked input projections (no recurrent dep;
            # the scheduler can hoist these off the serial chain).
            gin = []
            for s in range(T):
                tr = T - 1 - s
                gin.append(jnp.concatenate(
                    [xp_f[s * B:(s + 1) * B, :],
                     xp_r[tr * B:(tr + 1) * B, :]], axis=0))            # (2B, 4H)

            # ---- recurrence: fully unrolled, directions stacked -------------
            h = jnp.zeros((B2, H), f32)
            c = jnp.zeros((B2, H), f32)
            h_steps = []
            for s in range(T):
                if s == 0:
                    gates = gin[0]                       # h == 0 at first step
                else:
                    # padded LHS: fwd rows [h_f | 0], rev rows [0 | h_r]
                    h_pad = jnp.concatenate([h, h], axis=1) * mask2     # (2B, 2H)
                    gates = gin[s] + jnp.dot(h_pad, whh_v,
                                             preferred_element_type=f32)
                # one full-vreg sigmoid; g-gate lanes were pre-scaled by 2
                sg = jax.nn.sigmoid(gates * gate_scale)
                i_g = sg[:, 0 * H:1 * H]
                f_g = sg[:, 1 * H:2 * H]
                g_g = 2.0 * sg[:, 2 * H:3 * H] - 1.0     # == tanh(g)
                o_g = sg[:, 3 * H:4 * H]
                c = f_g * c + i_g * g_g
                h = o_g * jnp.tanh(c)
                h_steps.append(h)

            if layer == num_layers - 1:
                # out[:, -1, :] of the top layer = [h_fwd(T-1), h_rev(T-1)];
                # h_rev at original time T-1 is the reverse chain's step 0.
                last = jnp.concatenate(
                    [h_steps[T - 1][:B, :], h_steps[0][B:, :]], axis=1)  # (B, 2H)
            else:
                # Next layer's time-major input, assembled in registers
                # (no VMEM scratch, no masked stores):
                # row block t = [h_fwd(t) | h_rev(t)],  h_rev(t) = step T-1-t.
                rows = []
                for t in range(T):
                    rows.append(jnp.concatenate(
                        [h_steps[t][:B, :], h_steps[T - 1 - t][B:, :]],
                        axis=1))                                         # (B, 2H)
                layer_in = jnp.concatenate(rows, axis=0)                 # (T*B, 2H)

        # Fused FC head.
        logits = jnp.dot(last, wfc_ref[...],
                         preferred_element_type=jnp.float32) + bfc_ref[...]
        o_ref[...] = logits.astype(o_ref.dtype)

    return kernel


# -----------------------------------------------------------------------------
# Wrapper
# -----------------------------------------------------------------------------
@functools.partial(
    jax.jit, static_argnames=("hidden_size", "num_layers", "num_classes"))
def bilstm_forward(x, flat_params, *, hidden_size, num_layers, num_classes):
    """x: (B, T, D) -> logits (B, num_classes). Matches the PyTorch forward."""
    B, T, D = x.shape
    H = hidden_size
    kernel = _make_fused_bilstm_kernel(B, T, D, H, num_classes, num_layers)

    # Time-major rows (row = t*B + b): a tiny (~2 KB) HBM copy that makes every
    # per-timestep slice inside the kernel a contiguous static sublane window.
    x_tm = x.transpose(1, 0, 2).reshape(T * B, D)

    vmem = pl.BlockSpec(memory_space=pltpu.MemorySpace.VMEM)
    n_in = 1 + len(flat_params)
    return pl.pallas_call(
        kernel,
        out_shape=jax.ShapeDtypeStruct((B, num_classes), jnp.float32),
        in_specs=[vmem] * n_in,
        out_specs=vmem,
    )(x_tm, *flat_params)


# -----------------------------------------------------------------------------
# Deterministic parameter init (PyTorch-style uniform(-1/sqrt(H), 1/sqrt(H)))
# -----------------------------------------------------------------------------
def init_params(key, input_size, hidden_size, num_layers, num_classes):
    bound = 1.0 / float(hidden_size) ** 0.5
    lstm_params = []
    for layer in range(num_layers):
        d_in = input_size if layer == 0 else 2 * hidden_size
        dirs = []
        for _ in range(2):  # 0 = forward, 1 = reverse
            key, k1, k2, k3, k4 = jax.random.split(key, 5)
            w_ih = jax.random.uniform(k1, (4 * hidden_size, d_in),
                                      minval=-bound, maxval=bound)
            w_hh = jax.random.uniform(k2, (4 * hidden_size, hidden_size),
                                      minval=-bound, maxval=bound)
            b_ih = jax.random.uniform(k3, (4 * hidden_size,),
                                      minval=-bound, maxval=bound)
            b_hh = jax.random.uniform(k4, (4 * hidden_size,),
                                      minval=-bound, maxval=bound)
            dirs.append((
                w_ih.T.astype(jnp.float32),                        # (d_in, 4H)
                w_hh.T.astype(jnp.float32),                        # (H, 4H)
                (b_ih + b_hh).reshape(1, -1).astype(jnp.float32),  # (1, 4H)
            ))
        lstm_params.append(tuple(dirs))
    key, k1, k2 = jax.random.split(key, 3)
    fbound = 1.0 / float(2 * hidden_size) ** 0.5
    w_fc = jax.random.uniform(k1, (num_classes, 2 * hidden_size),
                              minval=-fbound, maxval=fbound)
    b_fc = jax.random.uniform(k2, (num_classes,), minval=-fbound, maxval=fbound)
    fc_params = (w_fc.T.astype(jnp.float32),                       # (2H, C)
                 b_fc.reshape(1, -1).astype(jnp.float32))          # (1, C)
    return tuple(lstm_params), fc_params


def flatten_params(lstm_params, fc_params):
    """Build the MERGED per-layer weights the kernel expects (done once here)."""
    flat = []
    for dirs in lstm_params:
        (wihT_f, whhT_f, b_f), (wihT_r, whhT_r, b_r) = dirs
        wih_m = jnp.concatenate([wihT_f, wihT_r], axis=1)   # (d_in, 8H) [fwd|rev]
        whh_m = jnp.concatenate([whhT_f, whhT_r], axis=0)   # (2H, 4H) vstack
        b_m = jnp.concatenate([b_f, b_r], axis=1)           # (1, 8H)
        flat.extend([wih_m, whh_m, b_m])
    flat.extend([fc_params[0], fc_params[1]])
    return tuple(flat)


# -----------------------------------------------------------------------------
# Pure-JAX reference (same math) for correctness check
# -----------------------------------------------------------------------------
def bilstm_ref(x, lstm_params, fc_params, hidden_size):
    H = hidden_size
    layer_in = x
    for dirs in lstm_params:
        dir_outs = []
        for d, (wihT, whhT, bias) in enumerate(dirs):
            xs = layer_in if d == 0 else layer_in[:, ::-1, :]
            B, T, _ = xs.shape
            h = jnp.zeros((B, H), jnp.float32)
            c = jnp.zeros((B, H), jnp.float32)
            hs = []
            for t in range(T):
                g = xs[:, t, :] @ wihT + h @ whhT + bias
                i_g = jax.nn.sigmoid(g[:, :H])
                f_g = jax.nn.sigmoid(g[:, H:2 * H])
                g_g = jnp.tanh(g[:, 2 * H:3 * H])
                o_g = jax.nn.sigmoid(g[:, 3 * H:])
                c = f_g * c + i_g * g_g
                h = o_g * jnp.tanh(c)
                hs.append(h)
            hs = jnp.stack(hs, axis=1)
            if d == 1:
                hs = hs[:, ::-1, :]
            dir_outs.append(hs)
        layer_in = jnp.concatenate(dir_outs, axis=-1)
    w_fcT, b_fc = fc_params
    return layer_in[:, -1, :] @ w_fcT + b_fc


# -----------------------------------------------------------------------------
if __name__ == "__main__":
    batch = 2
    seq_len = 8
    input_size = 28
    hidden_size = 32
    num_layers = 2
    num_classes = 10

    key = jax.random.PRNGKey(0)
    key, xkey = jax.random.split(key)
    x = jax.random.normal(xkey, (batch, seq_len, input_size), dtype=jnp.float32)

    lstm_params, fc_params = init_params(key, input_size, hidden_size,
                                         num_layers, num_classes)
    flat_params = flatten_params(lstm_params, fc_params)

    logits = bilstm_forward(x, flat_params,
                            hidden_size=hidden_size,
                            num_layers=num_layers,
                            num_classes=num_classes)
    logits = jax.block_until_ready(logits)

    ref = bilstm_ref(x, lstm_params, fc_params, hidden_size)
    assert logits.shape == (batch, num_classes)
    assert jnp.allclose(logits, ref, rtol=1e-3, atol=1e-3), (
        f"max abs err {jnp.max(jnp.abs(logits - ref))}")

    print("KERNEL_OK")
</pallas_src>

<mosaic_0001>
module attributes {stable_mosaic.version = 11 : i64} {
  func.func @kernel(%arg0: memref<16x28xf32, #tpu.memory_space<vmem>>, %arg1: memref<28x256xf32, #tpu.memory_space<vmem>>, %arg2: memref<64x128xf32, #tpu.memory_space<vmem>>, %arg3: memref<1x256xf32, #tpu.memory_space<vmem>>, %arg4: memref<64x256xf32, #tpu.memory_space<vmem>>, %arg5: memref<64x128xf32, #tpu.memory_space<vmem>>, %arg6: memref<1x256xf32, #tpu.memory_space<vmem>>, %arg7: memref<64x10xf32, #tpu.memory_space<vmem>>, %arg8: memref<1x10xf32, #tpu.memory_space<vmem>>, %arg9: memref<2x10xf32, #tpu.memory_space<vmem>>) attributes {dimension_semantics = [], scalar_prefetch = 0 : i64, scratch_operands = 0 : i64, tpu.core_type = #tpu.core_type<tc>} {
    %0 = tpu.iota {dimensions = array<i32: 0>} : vector<4x32xi32>
    %c2_i32 = arith.constant 2 : i32
    %1 = vector.broadcast %c2_i32 : i32 to vector<4x32xi32>
    %2 = arith.cmpi slt, %0, %1 : vector<4x32xi32>
    %3 = arith.extui %2 : vector<4x32xi1> to vector<4x32xi32>
    %4 = arith.sitofp %3 : vector<4x32xi32> to vector<4x32xf32>
    %cst = arith.constant 1.000000e+00 : f32
    %5 = vector.broadcast %cst : f32 to vector<4x32xf32>
    %6 = arith.subf %5, %4 : vector<4x32xf32>
    %7 = tpu.concatenate %4, %6 in 1 : vector<4x32xf32>, vector<4x32xf32> -> vector<4x64xf32>
    %8 = tpu.iota {dimensions = array<i32: 1>} : vector<4x128xi32>
    %c64_i32 = arith.constant 64 : i32
    %9 = vector.broadcast %c64_i32 : i32 to vector<4x128xi32>
    %10 = arith.cmpi sge, %8, %9 : vector<4x128xi32>
    %c96_i32 = arith.constant 96 : i32
    %11 = vector.broadcast %c96_i32 : i32 to vector<4x128xi32>
    %12 = arith.cmpi slt, %8, %11 : vector<4x128xi32>
    %13 = arith.andi %10, %12 : vector<4x128xi1>
    %cst_0 = arith.constant 2.000000e+00 : f32
    %cst_1 = arith.constant 1.000000e+00 : f32
    %14 = vector.broadcast %cst_0 : f32 to vector<4x128xf32>
    %15 = vector.broadcast %cst_1 : f32 to vector<4x128xf32>
    %16 = arith.select %13, %14, %15 : vector<4x128xi1>, vector<4x128xf32>
    %c0 = arith.constant 0 : index
    %c0_2 = arith.constant 0 : index
    %17 = vector.load %arg0[%c0, %c0_2] : memref<16x28xf32, #tpu.memory_space<vmem>>, vector<16x28xf32>
    %c0_3 = arith.constant 0 : index
    %c0_4 = arith.constant 0 : index
    %18 = vector.load %arg1[%c0_3, %c0_4] : memref<28x256xf32, #tpu.memory_space<vmem>>, vector<28x256xf32>
    %c0_5 = arith.constant 0 : index
    %c0_6 = arith.constant 0 : index
    %19 = vector.load %arg2[%c0_5, %c0_6] : memref<64x128xf32, #tpu.memory_space<vmem>>, vector<64x128xf32>
    %c0_7 = arith.constant 0 : index
    %c0_8 = arith.constant 0 : index
    %20 = vector.load %arg3[%c0_7, %c0_8] : memref<1x256xf32, #tpu.memory_space<vmem>>, vector<1x256xf32>
    %cst_9 = arith.constant dense<0.000000e+00> : vector<16x256xf32>
    %21 = tpu.matmul %17, %18, %cst_9 {dimension_numbers = #tpu.dot_dimension_numbers<[1], [0], [0], [1], [0, 0, 1, 1], [], []>} : vector<16x28xf32>, vector<28x256xf32>, vector<16x256xf32> -> vector<16x256xf32>
    %22 = vector.broadcast %20 : vector<1x256xf32> to vector<16x256xf32>
    %23 = arith.addf %21, %22 : vector<16x256xf32>
    %24 = vector.extract_strided_slice %23 {offsets = [0, 0], sizes = [16, 128], strides = [1, 1]} : vector<16x256xf32> to vector<16x128xf32>
    %25 = vector.extract_strided_slice %23 {offsets = [0, 128], sizes = [16, 128], strides = [1, 1]} : vector<16x256xf32> to vector<16x128xf32>
    %26 = vector.extract_strided_slice %24 {offsets = [0, 0], sizes = [2, 128], strides = [1, 1]} : vector<16x128xf32> to vector<2x128xf32>
    %27 = vector.extract_strided_slice %25 {offsets = [14, 0], sizes = [2, 128], strides = [1, 1]} : vector<16x128xf32> to vector<2x128xf32>
    %28 = tpu.concatenate %26, %27 in 0 : vector<2x128xf32>, vector<2x128xf32> -> vector<4x128xf32>
    %29 = vector.extract_strided_slice %24 {offsets = [2, 0], sizes = [2, 128], strides = [1, 1]} : vector<16x128xf32> to vector<2x128xf32>
    %30 = vector.extract_strided_slice %25 {offsets = [12, 0], sizes = [2, 128], strides = [1, 1]} : vector<16x128xf32> to vector<2x128xf32>
    %31 = tpu.concatenate %29, %30 in 0 : vector<2x128xf32>, vector<2x128xf32> -> vector<4x128xf32>
    %32 = vector.extract_strided_slice %24 {offsets = [4, 0], sizes = [2, 128], strides = [1, 1]} : vector<16x128xf32> to vector<2x128xf32>
    %33 = vector.extract_strided_slice %25 {offsets = [10, 0], sizes = [2, 128], strides = [1, 1]} : vector<16x128xf32> to vector<2x128xf32>
    %34 = tpu.concatenate %32, %33 in 0 : vector<2x128xf32>, vector<2x128xf32> -> vector<4x128xf32>
    %35 = vector.extract_strided_slice %24 {offsets = [6, 0], sizes = [2, 128], strides = [1, 1]} : vector<16x128xf32> to vector<2x128xf32>
    %36 = vector.extract_strided_slice %25 {offsets = [8, 0], sizes = [2, 128], strides = [1, 1]} : vector<16x128xf32> to vector<2x128xf32>
    %37 = tpu.concatenate %35, %36 in 0 : vector<2x128xf32>, vector<2x128xf32> -> vector<4x128xf32>
    %38 = vector.extract_strided_slice %24 {offsets = [8, 0], sizes = [2, 128], strides = [1, 1]} : vector<16x128xf32> to vector<2x128xf32>
    %39 = vector.extract_strided_slice %25 {offsets = [6, 0], sizes = [2, 128], strides = [1, 1]} : vector<16x128xf32> to vector<2x128xf32>
    %40 = tpu.concatenate %38, %39 in 0 : vector<2x128xf32>, vector<2x128xf32> -> vector<4x128xf32>
    %41 = vector.extract_strided_slice %24 {offsets = [10, 0], sizes = [2, 128], strides = [1, 1]} : vector<16x128xf32> to vector<2x128xf32>
    %42 = vector.extract_strided_slice %25 {offsets = [4, 0], sizes = [2, 128], strides = [1, 1]} : vector<16x128xf32> to vector<2x128xf32>
    %43 = tpu.concatenate %41, %42 in 0 : vector<2x128xf32>, vector<2x128xf32> -> vector<4x128xf32>
    %44 = vector.extract_strided_slice %24 {offsets = [12, 0], sizes = [2, 128], strides = [1, 1]} : vector<16x128xf32> to vector<2x128xf32>
    %45 = vector.extract_strided_slice %25 {offsets = [2, 0], sizes = [2, 128], strides = [1, 1]} : vector<16x128xf32> to vector<2x128xf32>
    %46 = tpu.concatenate %44, %45 in 0 : vector<2x128xf32>, vector<2x128xf32> -> vector<4x128xf32>
    %47 = vector.extract_strided_slice %24 {offsets = [14, 0], sizes = [2, 128], strides = [1, 1]} : vector<16x128xf32> to vector<2x128xf32>
    %48 = vector.extract_strided_slice %25 {offsets = [0, 0], sizes = [2, 128], strides = [1, 1]} : vector<16x128xf32> to vector<2x128xf32>
    %49 = tpu.concatenate %47, %48 in 0 : vector<2x128xf32>, vector<2x128xf32> -> vector<4x128xf32>
    %cst_10 = arith.constant 0.000000e+00 : f32
    %50 = vector.broadcast %cst_10 : f32 to vector<4x32xf32>
    %51 = arith.mulf %28, %16 : vector<4x128xf32>
    %52 = arith.negf %51 : vector<4x128xf32>
    %53 = math.exp %52 : vector<4x128xf32>
    %cst_11 = arith.constant 1.000000e+00 : f32
    %54 = vector.broadcast %cst_11 : f32 to vector<4x128xf32>
    %55 = arith.addf %54, %53 : vector<4x128xf32>
    %56 = arith.divf %54, %55 : vector<4x128xf32>
    %57 = vector.extract_strided_slice %56 {offsets = [0, 0], sizes = [4, 32], strides = [1, 1]} : vector<4x128xf32> to vector<4x32xf32>
    %58 = vector.extract_strided_slice %56 {offsets = [0, 32], sizes = [4, 32], strides = [1, 1]} : vector<4x128xf32> to vector<4x32xf32>
    %59 = vector.extract_strided_slice %56 {offsets = [0, 64], sizes = [4, 32], strides = [1, 1]} : vector<4x128xf32> to vector<4x32xf32>
    %cst_12 = arith.constant 2.000000e+00 : f32
    %60 = vector.broadcast %cst_12 : f32 to vector<4x32xf32>
    %61 = arith.mulf %60, %59 : vector<4x32xf32>
    %cst_13 = arith.constant 1.000000e+00 : f32
    %62 = vector.broadcast %cst_13 : f32 to vector<4x32xf32>
    %63 = arith.subf %61, %62 : vector<4x32xf32>
    %64 = vector.extract_strided_slice %56 {offsets = [0, 96], sizes = [4, 32], strides = [1, 1]} : vector<4x128xf32> to vector<4x32xf32>
    %65 = arith.mulf %58, %50 : vector<4x32xf32>
    %66 = arith.mulf %57, %63 : vector<4x32xf32>
    %67 = arith.addf %65, %66 : vector<4x32xf32>
    %68 = math.tanh %67 : vector<4x32xf32>
    %69 = arith.mulf %64, %68 : vector<4x32xf32>
    %70 = tpu.concatenate %69, %69 in 1 : vector<4x32xf32>, vector<4x32xf32> -> vector<4x64xf32>
    %71 = arith.mulf %70, %7 : vector<4x64xf32>
    %cst_14 = arith.constant dense<0.000000e+00> : vector<4x128xf32>
    %72 = tpu.matmul %71, %19, %cst_14 {dimension_numbers = #tpu.dot_dimension_numbers<[1], [0], [0], [1], [0, 0, 1, 1], [], []>} : vector<4x64xf32>, vector<64x128xf32>, vector<4x128xf32> -> vector<4x128xf32>
    %73 = arith.addf %31, %72 : vector<4x128xf32>
    %74 = arith.mulf %73, %16 : vector<4x128xf32>
    %75 = arith.negf %74 : vector<4x128xf32>
    %76 = math.exp %75 : vector<4x128xf32>
    %cst_15 = arith.constant 1.000000e+00 : f32
    %77 = vector.broadcast %cst_15 : f32 to vector<4x128xf32>
    %78 = arith.addf %77, %76 : vector<4x128xf32>
    %79 = arith.divf %77, %78 : vector<4x128xf32>
    %80 = vector.extract_strided_slice %79 {offsets = [0, 0], sizes = [4, 32], strides = [1, 1]} : vector<4x128xf32> to vector<4x32xf32>
    %81 = vector.extract_strided_slice %79 {offsets = [0, 32], sizes = [4, 32], strides = [1, 1]} : vector<4x128xf32> to vector<4x32xf32>
    %82 = vector.extract_strided_slice %79 {offsets = [0, 64], sizes = [4, 32], strides = [1, 1]} : vector<4x128xf32> to vector<4x32xf32>
    %cst_16 = arith.constant 2.000000e+00 : f32
    %83 = vector.broadcast %cst_16 : f32 to vector<4x32xf32>
    %84 = arith.mulf %83, %82 : vector<4x32xf32>
    %cst_17 = arith.constant 1.000000e+00 : f32
    %85 = vector.broadcast %cst_17 : f32 to vector<4x32xf32>
    %86 = arith.subf %84, %85 : vector<4x32xf32>
    %87 = vector.extract_strided_slice %79 {offsets = [0, 96], sizes = [4, 32], strides = [1, 1]} : vector<4x128xf32> to vector<4x32xf32>
    %88 = arith.mulf %81, %67 : vector<4x32xf32>
    %89 = arith.mulf %80, %86 : vector<4x32xf32>
    %90 = arith.addf %88, %89 : vector<4x32xf32>
    %91 = math.tanh %90 : vector<4x32xf32>
    %92 = arith.mulf %87, %91 : vector<4x32xf32>
    %93 = tpu.concatenate %92, %92 in 1 : vector<4x32xf32>, vector<4x32xf32> -> vector<4x64xf32>
    %94 = arith.mulf %93, %7 : vector<4x64xf32>
    %cst_18 = arith.constant dense<0.000000e+00> : vector<4x128xf32>
    %95 = tpu.matmul %94, %19, %cst_18 {dimension_numbers = #tpu.dot_dimension_numbers<[1], [0], [0], [1], [0, 0, 1, 1], [], []>} : vector<4x64xf32>, vector<64x128xf32>, vector<4x128xf32> -> vector<4x128xf32>
    %96 = arith.addf %34, %95 : vector<4x128xf32>
    %97 = arith.mulf %96, %16 : vector<4x128xf32>
    %98 = arith.negf %97 : vector<4x128xf32>
    %99 = math.exp %98 : vector<4x128xf32>
    %cst_19 = arith.constant 1.000000e+00 : f32
    %100 = vector.broadcast %cst_19 : f32 to vector<4x128xf32>
    %101 = arith.addf %100, %99 : vector<4x128xf32>
    %102 = arith.divf %100, %101 : vector<4x128xf32>
    %103 = vector.extract_strided_slice %102 {offsets = [0, 0], sizes = [4, 32], strides = [1, 1]} : vector<4x128xf32> to vector<4x32xf32>
    %104 = vector.extract_strided_slice %102 {offsets = [0, 32], sizes = [4, 32], strides = [1, 1]} : vector<4x128xf32> to vector<4x32xf32>
    %105 = vector.extract_strided_slice %102 {offsets = [0, 64], sizes = [4, 32], strides = [1, 1]} : vector<4x128xf32> to vector<4x32xf32>
    %cst_20 = arith.constant 2.000000e+00 : f32
    %106 = vector.broadcast %cst_20 : f32 to vector<4x32xf32>
    %107 = arith.mulf %106, %105 : vector<4x32xf32>
    %cst_21 = arith.constant 1.000000e+00 : f32
    %108 = vector.broadcast %cst_21 : f32 to vector<4x32xf32>
    %109 = arith.subf %107, %108 : vector<4x32xf32>
    %110 = vector.extract_strided_slice %102 {offsets = [0, 96], sizes = [4, 32], strides = [1, 1]} : vector<4x128xf32> to vector<4x32xf32>
    %111 = arith.mulf %104, %90 : vector<4x32xf32>
    %112 = arith.mulf %103, %109 : vector<4x32xf32>
    %113 = arith.addf %111, %112 : vector<4x32xf32>
    %114 = math.tanh %113 : vector<4x32xf32>
    %115 = arith.mulf %110, %114 : vector<4x32xf32>
    %116 = tpu.concatenate %115, %115 in 1 : vector<4x32xf32>, vector<4x32xf32> -> vector<4x64xf32>
    %117 = arith.mulf %116, %7 : vector<4x64xf32>
    %cst_22 = arith.constant dense<0.000000e+00> : vector<4x128xf32>
    %118 = tpu.matmul %117, %19, %cst_22 {dimension_numbers = #tpu.dot_dimension_numbers<[1], [0], [0], [1], [0, 0, 1, 1], [], []>} : vector<4x64xf32>, vector<64x128xf32>, vector<4x128xf32> -> vector<4x128xf32>
    %119 = arith.addf %37, %118 : vector<4x128xf32>
    %120 = arith.mulf %119, %16 : vector<4x128xf32>
    %121 = arith.negf %120 : vector<4x128xf32>
    %122 = math.exp %121 : vector<4x128xf32>
    %cst_23 = arith.constant 1.000000e+00 : f32
    %123 = vector.broadcast %cst_23 : f32 to vector<4x128xf32>
    %124 = arith.addf %123, %122 : vector<4x128xf32>
    %125 = arith.divf %123, %124 : vector<4x128xf32>
    %126 = vector.extract_strided_slice %125 {offsets = [0, 0], sizes = [4, 32], strides = [1, 1]} : vector<4x128xf32> to vector<4x32xf32>
    %127 = vector.extract_strided_slice %125 {offsets = [0, 32], sizes = [4, 32], strides = [1, 1]} : vector<4x128xf32> to vector<4x32xf32>
    %128 = vector.extract_strided_slice %125 {offsets = [0, 64], sizes = [4, 32], strides = [1, 1]} : vector<4x128xf32> to vector<4x32xf32>
    %cst_24 = arith.constant 2.000000e+00 : f32
    %129 = vector.broadcast %cst_24 : f32 to vector<4x32xf32>
    %130 = arith.mulf %129, %128 : vector<4x32xf32>
    %cst_25 = arith.constant 1.000000e+00 : f32
    %131 = vector.broadcast %cst_25 : f32 to vector<4x32xf32>
    %132 = arith.subf %130, %131 : vector<4x32xf32>
    %133 = vector.extract_strided_slice %125 {offsets = [0, 96], sizes = [4, 32], strides = [1, 1]} : vector<4x128xf32> to vector<4x32xf32>
    %134 = arith.mulf %127, %113 : vector<4x32xf32>
    %135 = arith.mulf %126, %132 : vector<4x32xf32>
    %136 = arith.addf %134, %135 : vector<4x32xf32>
    %137 = math.tanh %136 : vector<4x32xf32>
    %138 = arith.mulf %133, %137 : vector<4x32xf32>
    %139 = tpu.concatenate %138, %138 in 1 : vector<4x32xf32>, vector<4x32xf32> -> vector<4x64xf32>
    %140 = arith.mulf %139, %7 : vector<4x64xf32>
    %cst_26 = arith.constant dense<0.000000e+00> : vector<4x128xf32>
    %141 = tpu.matmul %140, %19, %cst_26 {dimension_numbers = #tpu.dot_dimension_numbers<[1], [0], [0], [1], [0, 0, 1, 1], [], []>} : vector<4x64xf32>, vector<64x128xf32>, vector<4x128xf32> -> vector<4x128xf32>
    %142 = arith.addf %40, %141 : vector<4x128xf32>
    %143 = arith.mulf %142, %16 : vector<4x128xf32>
    %144 = arith.negf %143 : vector<4x128xf32>
    %145 = math.exp %144 : vector<4x128xf32>
    %cst_27 = arith.constant 1.000000e+00 : f32
    %146 = vector.broadcast %cst_27 : f32 to vector<4x128xf32>
    %147 = arith.addf %146, %145 : vector<4x128xf32>
    %148 = arith.divf %146, %147 : vector<4x128xf32>
    %149 = vector.extract_strided_slice %148 {offsets = [0, 0], sizes = [4, 32], strides = [1, 1]} : vector<4x128xf32> to vector<4x32xf32>
    %150 = vector.extract_strided_slice %148 {offsets = [0, 32], sizes = [4, 32], strides = [1, 1]} : vector<4x128xf32> to vector<4x32xf32>
    %151 = vector.extract_strided_slice %148 {offsets = [0, 64], sizes = [4, 32], strides = [1, 1]} : vector<4x128xf32> to vector<4x32xf32>
    %cst_28 = arith.constant 2.000000e+00 : f32
    %152 = vector.broadcast %cst_28 : f32 to vector<4x32xf32>
    %153 = arith.mulf %152, %151 : vector<4x32xf32>
    %cst_29 = arith.constant 1.000000e+00 : f32
    %154 = vector.broadcast %cst_29 : f32 to vector<4x32xf32>
    %155 = arith.subf %153, %154 : vector<4x32xf32>
    %156 = vector.extract_strided_slice %148 {offsets = [0, 96], sizes = [4, 32], strides = [1, 1]} : vector<4x128xf32> to vector<4x32xf32>
    %157 = arith.mulf %150, %136 : vector<4x32xf32>
    %158 = arith.mulf %149, %155 : vector<4x32xf32>
    %159 = arith.addf %157, %158 : vector<4x32xf32>
    %160 = math.tanh %159 : vector<4x32xf32>
    %161 = arith.mulf %156, %160 : vector<4x32xf32>
    %162 = tpu.concatenate %161, %161 in 1 : vector<4x32xf32>, vector<4x32xf32> -> vector<4x64xf32>
    %163 = arith.mulf %162, %7 : vector<4x64xf32>
    %cst_30 = arith.constant dense<0.000000e+00> : vector<4x128xf32>
    %164 = tpu.matmul %163, %19, %cst_30 {dimension_numbers = #tpu.dot_dimension_numbers<[1], [0], [0], [1], [0, 0, 1, 1], [], []>} : vector<4x64xf32>, vector<64x128xf32>, vector<4x128xf32> -> vector<4x128xf32>
    %165 = arith.addf %43, %164 : vector<4x128xf32>
    %166 = arith.mulf %165, %16 : vector<4x128xf32>
    %167 = arith.negf %166 : vector<4x128xf32>
    %168 = math.exp %167 : vector<4x128xf32>
    %cst_31 = arith.constant 1.000000e+00 : f32
    %169 = vector.broadcast %cst_31 : f32 to vector<4x128xf32>
    %170 = arith.addf %169, %168 : vector<4x128xf32>
    %171 = arith.divf %169, %170 : vector<4x128xf32>
    %172 = vector.extract_strided_slice %171 {offsets = [0, 0], sizes = [4, 32], strides = [1, 1]} : vector<4x128xf32> to vector<4x32xf32>
    %173 = vector.extract_strided_slice %171 {offsets = [0, 32], sizes = [4, 32], strides = [1, 1]} : vector<4x128xf32> to vector<4x32xf32>
    %174 = vector.extract_strided_slice %171 {offsets = [0, 64], sizes = [4, 32], strides = [1, 1]} : vector<4x128xf32> to vector<4x32xf32>
    %cst_32 = arith.constant 2.000000e+00 : f32
    %175 = vector.broadcast %cst_32 : f32 to vector<4x32xf32>
    %176 = arith.mulf %175, %174 : vector<4x32xf32>
    %cst_33 = arith.constant 1.000000e+00 : f32
    %177 = vector.broadcast %cst_33 : f32 to vector<4x32xf32>
    %178 = arith.subf %176, %177 : vector<4x32xf32>
    %179 = vector.extract_strided_slice %171 {offsets = [0, 96], sizes = [4, 32], strides = [1, 1]} : vector<4x128xf32> to vector<4x32xf32>
    %180 = arith.mulf %173, %159 : vector<4x32xf32>
    %181 = arith.mulf %172, %178 : vector<4x32xf32>
    %182 = arith.addf %180, %181 : vector<4x32xf32>
    %183 = math.tanh %182 : vector<4x32xf32>
    %184 = arith.mulf %179, %183 : vector<4x32xf32>
    %185 = tpu.concatenate %184, %184 in 1 : vector<4x32xf32>, vector<4x32xf32> -> vector<4x64xf32>
    %186 = arith.mulf %185, %7 : vector<4x64xf32>
    %cst_34 = arith.constant dense<0.000000e+00> : vector<4x128xf32>
    %187 = tpu.matmul %186, %19, %cst_34 {dimension_numbers = #tpu.dot_dimension_numbers<[1], [0], [0], [1], [0, 0, 1, 1], [], []>} : vector<4x64xf32>, vector<64x128xf32>, vector<4x128xf32> -> vector<4x128xf32>
    %188 = arith.addf %46, %187 : vector<4x128xf32>
    %189 = arith.mulf %188, %16 : vector<4x128xf32>
    %190 = arith.negf %189 : vector<4x128xf32>
    %191 = math.exp %190 : vector<4x128xf32>
    %cst_35 = arith.constant 1.000000e+00 : f32
    %192 = vector.broadcast %cst_35 : f32 to vector<4x128xf32>
    %193 = arith.addf %192, %191 : vector<4x128xf32>
    %194 = arith.divf %192, %193 : vector<4x128xf32>
    %195 = vector.extract_strided_slice %194 {offsets = [0, 0], sizes = [4, 32], strides = [1, 1]} : vector<4x128xf32> to vector<4x32xf32>
    %196 = vector.extract_strided_slice %194 {offsets = [0, 32], sizes = [4, 32], strides = [1, 1]} : vector<4x128xf32> to vector<4x32xf32>
    %197 = vector.extract_strided_slice %194 {offsets = [0, 64], sizes = [4, 32], strides = [1, 1]} : vector<4x128xf32> to vector<4x32xf32>
    %cst_36 = arith.constant 2.000000e+00 : f32
    %198 = vector.broadcast %cst_36 : f32 to vector<4x32xf32>
    %199 = arith.mulf %198, %197 : vector<4x32xf32>
    %cst_37 = arith.constant 1.000000e+00 : f32
    %200 = vector.broadcast %cst_37 : f32 to vector<4x32xf32>
    %201 = arith.subf %199, %200 : vector<4x32xf32>
    %202 = vector.extract_strided_slice %194 {offsets = [0, 96], sizes = [4, 32], strides = [1, 1]} : vector<4x128xf32> to vector<4x32xf32>
    %203 = arith.mulf %196, %182 : vector<4x32xf32>
    %204 = arith.mulf %195, %201 : vector<4x32xf32>
    %205 = arith.addf %203, %204 : vector<4x32xf32>
    %206 = math.tanh %205 : vector<4x32xf32>
    %207 = arith.mulf %202, %206 : vector<4x32xf32>
    %208 = tpu.concatenate %207, %207 in 1 : vector<4x32xf32>, vector<4x32xf32> -> vector<4x64xf32>
    %209 = arith.mulf %208, %7 : vector<4x64xf32>
    %cst_38 = arith.constant dense<0.000000e+00> : vector<4x128xf32>
    %210 = tpu.matmul %209, %19, %cst_38 {dimension_numbers = #tpu.dot_dimension_numbers<[1], [0], [0], [1], [0, 0, 1, 1], [], []>} : vector<4x64xf32>, vector<64x128xf32>, vector<4x128xf32> -> vector<4x128xf32>
    %211 = arith.addf %49, %210 : vector<4x128xf32>
    %212 = arith.mulf %211, %16 : vector<4x128xf32>
    %213 = arith.negf %212 : vector<4x128xf32>
    %214 = math.exp %213 : vector<4x128xf32>
    %cst_39 = arith.constant 1.000000e+00 : f32
    %215 = vector.broadcast %cst_39 : f32 to vector<4x128xf32>
    %216 = arith.addf %215, %214 : vector<4x128xf32>
    %217 = arith.divf %215, %216 : vector<4x128xf32>
    %218 = vector.extract_strided_slice %217 {offsets = [0, 0], sizes = [4, 32], strides = [1, 1]} : vector<4x128xf32> to vector<4x32xf32>
    %219 = vector.extract_strided_slice %217 {offsets = [0, 32], sizes = [4, 32], strides = [1, 1]} : vector<4x128xf32> to vector<4x32xf32>
    %220 = vector.extract_strided_slice %217 {offsets = [0, 64], sizes = [4, 32], strides = [1, 1]} : vector<4x128xf32> to vector<4x32xf32>
    %cst_40 = arith.constant 2.000000e+00 : f32
    %221 = vector.broadcast %cst_40 : f32 to vector<4x32xf32>
    %222 = arith.mulf %221, %220 : vector<4x32xf32>
    %cst_41 = arith.constant 1.000000e+00 : f32
    %223 = vector.broadcast %cst_41 : f32 to vector<4x32xf32>
    %224 = arith.subf %222, %223 : vector<4x32xf32>
    %225 = vector.extract_strided_slice %217 {offsets = [0, 96], sizes = [4, 32], strides = [1, 1]} : vector<4x128xf32> to vector<4x32xf32>
    %226 = arith.mulf %219, %205 : vector<4x32xf32>
    %227 = arith.mulf %218, %224 : vector<4x32xf32>
    %228 = arith.addf %226, %227 : vector<4x32xf32>
    %229 = math.tanh %228 : vector<4x32xf32>
    %230 = arith.mulf %225, %229 : vector<4x32xf32>
    %231 = vector.extract_strided_slice %69 {offsets = [0, 0], sizes = [2, 32], strides = [1, 1]} : vector<4x32xf32> to vector<2x32xf32>
    %232 = vector.extract_strided_slice %230 {offsets = [2, 0], sizes = [2, 32], strides = [1, 1]} : vector<4x32xf32> to vector<2x32xf32>
    %233 = tpu.concatenate %231, %232 in 1 : vector<2x32xf32>, vector<2x32xf32> -> vector<2x64xf32>
    %234 = vector.extract_strided_slice %92 {offsets = [0, 0], sizes = [2, 32], strides = [1, 1]} : vector<4x32xf32> to vector<2x32xf32>
    %235 = vector.extract_strided_slice %207 {offsets = [2, 0], sizes = [2, 32], strides = [1, 1]} : vector<4x32xf32> to vector<2x32xf32>
    %236 = tpu.concatenate %234, %235 in 1 : vector<2x32xf32>, vector<2x32xf32> -> vector<2x64xf32>
    %237 = vector.extract_strided_slice %115 {offsets = [0, 0], sizes = [2, 32], strides = [1, 1]} : vector<4x32xf32> to vector<2x32xf32>
    %238 = vector.extract_strided_slice %184 {offsets = [2, 0], sizes = [2, 32], strides = [1, 1]} : vector<4x32xf32> to vector<2x32xf32>
    %239 = tpu.concatenate %237, %238 in 1 : vector<2x32xf32>, vector<2x32xf32> -> vector<2x64xf32>
    %240 = vector.extract_strided_slice %138 {offsets = [0, 0], sizes = [2, 32], strides = [1, 1]} : vector<4x32xf32> to vector<2x32xf32>
    %241 = vector.extract_strided_slice %161 {offsets = [2, 0], sizes = [2, 32], strides = [1, 1]} : vector<4x32xf32> to vector<2x32xf32>
    %242 = tpu.concatenate %240, %241 in 1 : vector<2x32xf32>, vector<2x32xf32> -> vector<2x64xf32>
    %243 = vector.extract_strided_slice %161 {offsets = [0, 0], sizes = [2, 32], strides = [1, 1]} : vector<4x32xf32> to vector<2x32xf32>
    %244 = vector.extract_strided_slice %138 {offsets = [2, 0], sizes = [2, 32], strides = [1, 1]} : vector<4x32xf32> to vector<2x32xf32>
    %245 = tpu.concatenate %243, %244 in 1 : vector<2x32xf32>, vector<2x32xf32> -> vector<2x64xf32>
    %246 = vector.extract_strided_slice %184 {offsets = [0, 0], sizes = [2, 32], strides = [1, 1]} : vector<4x32xf32> to vector<2x32xf32>
    %247 = vector.extract_strided_slice %115 {offsets = [2, 0], sizes = [2, 32], strides = [1, 1]} : vector<4x32xf32> to vector<2x32xf32>
    %248 = tpu.concatenate %246, %247 in 1 : vector<2x32xf32>, vector<2x32xf32> -> vector<2x64xf32>
    %249 = vector.extract_strided_slice %207 {offsets = [0, 0], sizes = [2, 32], strides = [1, 1]} : vector<4x32xf32> to vector<2x32xf32>
    %250 = vector.extract_strided_slice %92 {offsets = [2, 0], sizes = [2, 32], strides = [1, 1]} : vector<4x32xf32> to vector<2x32xf32>
    %251 = tpu.concatenate %249, %250 in 1 : vector<2x32xf32>, vector<2x32xf32> -> vector<2x64xf32>
    %252 = vector.extract_strided_slice %230 {offsets = [0, 0], sizes = [2, 32], strides = [1, 1]} : vector<4x32xf32> to vector<2x32xf32>
    %253 = vector.extract_strided_slice %69 {offsets = [2, 0], sizes = [2, 32], strides = [1, 1]} : vector<4x32xf32> to vector<2x32xf32>
    %254 = tpu.concatenate %252, %253 in 1 : vector<2x32xf32>, vector<2x32xf32> -> vector<2x64xf32>
    %255 = tpu.concatenate %233, %236, %239, %242, %245, %248, %251, %254 in 0 : vector<2x64xf32>, vector<2x64xf32>, vector<2x64xf32>, vector<2x64xf32>, vector<2x64xf32>, vector<2x64xf32>, vector<2x64xf32>, vector<2x64xf32> -> vector<16x64xf32>
    %c0_42 = arith.constant 0 : index
    %c0_43 = arith.constant 0 : index
    %256 = vector.load %arg4[%c0_42, %c0_43] : memref<64x256xf32, #tpu.memory_space<vmem>>, vector<64x256xf32>
    %c0_44 = arith.constant 0 : index
    %c0_45 = arith.constant 0 : index
    %257 = vector.load %arg5[%c0_44, %c0_45] : memref<64x128xf32, #tpu.memory_space<vmem>>, vector<64x128xf32>
    %c0_46 = arith.constant 0 : index
    %c0_47 = arith.constant 0 : index
    %258 = vector.load %arg6[%c0_46, %c0_47] : memref<1x256xf32, #tpu.memory_space<vmem>>, vector<1x256xf32>
    %cst_48 = arith.constant dense<0.000000e+00> : vector<16x256xf32>
    %259 = tpu.matmul %255, %256, %cst_48 {dimension_numbers = #tpu.dot_dimension_numbers<[1], [0], [0], [1], [0, 0, 1, 1], [], []>} : vector<16x64xf32>, vector<64x256xf32>, vector<16x256xf32> -> vector<16x256xf32>
    %260 = vector.broadcast %258 : vector<1x256xf32> to vector<16x256xf32>
    %261 = arith.addf %259, %260 : vector<16x256xf32>
    %262 = vector.extract_strided_slice %261 {offsets = [0, 0], sizes = [16, 128], strides = [1, 1]} : vector<16x256xf32> to vector<16x128xf32>
    %263 = vector.extract_strided_slice %261 {offsets = [0, 128], sizes = [16, 128], strides = [1, 1]} : vector<16x256xf32> to vector<16x128xf32>
    %264 = vector.extract_strided_slice %262 {offsets = [0, 0], sizes = [2, 128], strides = [1, 1]} : vector<16x128xf32> to vector<2x128xf32>
    %265 = vector.extract_strided_slice %263 {offsets = [14, 0], sizes = [2, 128], strides = [1, 1]} : vector<16x128xf32> to vector<2x128xf32>
    %266 = tpu.concatenate %264, %265 in 0 : vector<2x128xf32>, vector<2x128xf32> -> vector<4x128xf32>
    %267 = vector.extract_strided_slice %262 {offsets = [2, 0], sizes = [2, 128], strides = [1, 1]} : vector<16x128xf32> to vector<2x128xf32>
    %268 = vector.extract_strided_slice %263 {offsets = [12, 0], sizes = [2, 128], strides = [1, 1]} : vector<16x128xf32> to vector<2x128xf32>
    %269 = tpu.concatenate %267, %268 in 0 : vector<2x128xf32>, vector<2x128xf32> -> vector<4x128xf32>
    %270 = vector.extract_strided_slice %262 {offsets = [4, 0], sizes = [2, 128], strides = [1, 1]} : vector<16x128xf32> to vector<2x128xf32>
    %271 = vector.extract_strided_slice %263 {offsets = [10, 0], sizes = [2, 128], strides = [1, 1]} : vector<16x128xf32> to vector<2x128xf32>
    %272 = tpu.concatenate %270, %271 in 0 : vector<2x128xf32>, vector<2x128xf32> -> vector<4x128xf32>
    %273 = vector.extract_strided_slice %262 {offsets = [6, 0], sizes = [2, 128], strides = [1, 1]} : vector<16x128xf32> to vector<2x128xf32>
    %274 = vector.extract_strided_slice %263 {offsets = [8, 0], sizes = [2, 128], strides = [1, 1]} : vector<16x128xf32> to vector<2x128xf32>
    %275 = tpu.concatenate %273, %274 in 0 : vector<2x128xf32>, vector<2x128xf32> -> vector<4x128xf32>
    %276 = vector.extract_strided_slice %262 {offsets = [8, 0], sizes = [2, 128], strides = [1, 1]} : vector<16x128xf32> to vector<2x128xf32>
    %277 = vector.extract_strided_slice %263 {offsets = [6, 0], sizes = [2, 128], strides = [1, 1]} : vector<16x128xf32> to vector<2x128xf32>
    %278 = tpu.concatenate %276, %277 in 0 : vector<2x128xf32>, vector<2x128xf32> -> vector<4x128xf32>
    %279 = vector.extract_strided_slice %262 {offsets = [10, 0], sizes = [2, 128], strides = [1, 1]} : vector<16x128xf32> to vector<2x128xf32>
    %280 = vector.extract_strided_slice %263 {offsets = [4, 0], sizes = [2, 128], strides = [1, 1]} : vector<16x128xf32> to vector<2x128xf32>
    %281 = tpu.concatenate %279, %280 in 0 : vector<2x128xf32>, vector<2x128xf32> -> vector<4x128xf32>
    %282 = vector.extract_strided_slice %262 {offsets = [12, 0], sizes = [2, 128], strides = [1, 1]} : vector<16x128xf32> to vector<2x128xf32>
    %283 = vector.extract_strided_slice %263 {offsets = [2, 0], sizes = [2, 128], strides = [1, 1]} : vector<16x128xf32> to vector<2x128xf32>
    %284 = tpu.concatenate %282, %283 in 0 : vector<2x128xf32>, vector<2x128xf32> -> vector<4x128xf32>
    %285 = vector.extract_strided_slice %262 {offsets = [14, 0], sizes = [2, 128], strides = [1, 1]} : vector<16x128xf32> to vector<2x128xf32>
    %286 = vector.extract_strided_slice %263 {offsets = [0, 0], sizes = [2, 128], strides = [1, 1]} : vector<16x128xf32> to vector<2x128xf32>
    %287 = tpu.concatenate %285, %286 in 0 : vector<2x128xf32>, vector<2x128xf32> -> vector<4x128xf32>
    %cst_49 = arith.constant 0.000000e+00 : f32
    %288 = vector.broadcast %cst_49 : f32 to vector<4x32xf32>
    %289 = arith.mulf %266, %16 : vector<4x128xf32>
    %290 = arith.negf %289 : vector<4x128xf32>
    %291 = math.exp %290 : vector<4x128xf32>
    %cst_50 = arith.constant 1.000000e+00 : f32
    %292 = vector.broadcast %cst_50 : f32 to vector<4x128xf32>
    %293 = arith.addf %292, %291 : vector<4x128xf32>
    %294 = arith.divf %292, %293 : vector<4x128xf32>
    %295 = vector.extract_strided_slice %294 {offsets = [0, 0], sizes = [4, 32], strides = [1, 1]} : vector<4x128xf32> to vector<4x32xf32>
    %296 = vector.extract_strided_slice %294 {offsets = [0, 32], sizes = [4, 32], strides = [1, 1]} : vector<4x128xf32> to vector<4x32xf32>
    %297 = vector.extract_strided_slice %294 {offsets = [0, 64], sizes = [4, 32], strides = [1, 1]} : vector<4x128xf32> to vector<4x32xf32>
    %cst_51 = arith.constant 2.000000e+00 : f32
    %298 = vector.broadcast %cst_51 : f32 to vector<4x32xf32>
    %299 = arith.mulf %298, %297 : vector<4x32xf32>
    %cst_52 = arith.constant 1.000000e+00 : f32
    %300 = vector.broadcast %cst_52 : f32 to vector<4x32xf32>
    %301 = arith.subf %299, %300 : vector<4x32xf32>
    %302 = vector.extract_strided_slice %294 {offsets = [0, 96], sizes = [4, 32], strides = [1, 1]} : vector<4x128xf32> to vector<4x32xf32>
    %303 = arith.mulf %296, %288 : vector<4x32xf32>
    %304 = arith.mulf %295, %301 : vector<4x32xf32>
    %305 = arith.addf %303, %304 : vector<4x32xf32>
    %306 = math.tanh %305 : vector<4x32xf32>
    %307 = arith.mulf %302, %306 : vector<4x32xf32>
    %308 = tpu.concatenate %307, %307 in 1 : vector<4x32xf32>, vector<4x32xf32> -> vector<4x64xf32>
    %309 = arith.mulf %308, %7 : vector<4x64xf32>
    %cst_53 = arith.constant dense<0.000000e+00> : vector<4x128xf32>
    %310 = tpu.matmul %309, %257, %cst_53 {dimension_numbers = #tpu.dot_dimension_numbers<[1], [0], [0], [1], [0, 0, 1, 1], [], []>} : vector<4x64xf32>, vector<64x128xf32>, vector<4x128xf32> -> vector<4x128xf32>
    %311 = arith.addf %269, %310 : vector<4x128xf32>
    %312 = arith.mulf %311, %16 : vector<4x128xf32>
    %313 = arith.negf %312 : vector<4x128xf32>
    %314 = math.exp %313 : vector<4x128xf32>
    %cst_54 = arith.constant 1.000000e+00 : f32
    %315 = vector.broadcast %cst_54 : f32 to vector<4x128xf32>
    %316 = arith.addf %315, %314 : vector<4x128xf32>
    %317 = arith.divf %315, %316 : vector<4x128xf32>
    %318 = vector.extract_strided_slice %317 {offsets = [0, 0], sizes = [4, 32], strides = [1, 1]} : vector<4x128xf32> to vector<4x32xf32>
    %319 = vector.extract_strided_slice %317 {offsets = [0, 32], sizes = [4, 32], strides = [1, 1]} : vector<4x128xf32> to vector<4x32xf32>
    %320 = vector.extract_strided_slice %317 {offsets = [0, 64], sizes = [4, 32], strides = [1, 1]} : vector<4x128xf32> to vector<4x32xf32>
    %cst_55 = arith.constant 2.000000e+00 : f32
    %321 = vector.broadcast %cst_55 : f32 to vector<4x32xf32>
    %322 = arith.mulf %321, %320 : vector<4x32xf32>
    %cst_56 = arith.constant 1.000000e+00 : f32
    %323 = vector.broadcast %cst_56 : f32 to vector<4x32xf32>
    %324 = arith.subf %322, %323 : vector<4x32xf32>
    %325 = vector.extract_strided_slice %317 {offsets = [0, 96], sizes = [4, 32], strides = [1, 1]} : vector<4x128xf32> to vector<4x32xf32>
    %326 = arith.mulf %319, %305 : vector<4x32xf32>
    %327 = arith.mulf %318, %324 : vector<4x32xf32>
    %328 = arith.addf %326, %327 : vector<4x32xf32>
    %329 = math.tanh %328 : vector<4x32xf32>
    %330 = arith.mulf %325, %329 : vector<4x32xf32>
    %331 = tpu.concatenate %330, %330 in 1 : vector<4x32xf32>, vector<4x32xf32> -> vector<4x64xf32>
    %332 = arith.mulf %331, %7 : vector<4x64xf32>
    %cst_57 = arith.constant dense<0.000000e+00> : vector<4x128xf32>
    %333 = tpu.matmul %332, %257, %cst_57 {dimension_numbers = #tpu.dot_dimension_numbers<[1], [0], [0], [1], [0, 0, 1, 1], [], []>} : vector<4x64xf32>, vector<64x128xf32>, vector<4x128xf32> -> vector<4x128xf32>
    %334 = arith.addf %272, %333 : vector<4x128xf32>
    %335 = arith.mulf %334, %16 : vector<4x128xf32>
    %336 = arith.negf %335 : vector<4x128xf32>
    %337 = math.exp %336 : vector<4x128xf32>
    %cst_58 = arith.constant 1.000000e+00 : f32
    %338 = vector.broadcast %cst_58 : f32 to vector<4x128xf32>
    %339 = arith.addf %338, %337 : vector<4x128xf32>
    %340 = arith.divf %338, %339 : vector<4x128xf32>
    %341 = vector.extract_strided_slice %340 {offsets = [0, 0], sizes = [4, 32], strides = [1, 1]} : vector<4x128xf32> to vector<4x32xf32>
    %342 = vector.extract_strided_slice %340 {offsets = [0, 32], sizes = [4, 32], strides = [1, 1]} : vector<4x128xf32> to vector<4x32xf32>
    %343 = vector.extract_strided_slice %340 {offsets = [0, 64], sizes = [4, 32], strides = [1, 1]} : vector<4x128xf32> to vector<4x32xf32>
    %cst_59 = arith.constant 2.000000e+00 : f32
    %344 = vector.broadcast %cst_59 : f32 to vector<4x32xf32>
    %345 = arith.mulf %344, %343 : vector<4x32xf32>
    %cst_60 = arith.constant 1.000000e+00 : f32
    %346 = vector.broadcast %cst_60 : f32 to vector<4x32xf32>
    %347 = arith.subf %345, %346 : vector<4x32xf32>
    %348 = vector.extract_strided_slice %340 {offsets = [0, 96], sizes = [4, 32], strides = [1, 1]} : vector<4x128xf32> to vector<4x32xf32>
    %349 = arith.mulf %342, %328 : vector<4x32xf32>
    %350 = arith.mulf %341, %347 : vector<4x32xf32>
    %351 = arith.addf %349, %350 : vector<4x32xf32>
    %352 = math.tanh %351 : vector<4x32xf32>
    %353 = arith.mulf %348, %352 : vector<4x32xf32>
    %354 = tpu.concatenate %353, %353 in 1 : vector<4x32xf32>, vector<4x32xf32> -> vector<4x64xf32>
    %355 = arith.mulf %354, %7 : vector<4x64xf32>
    %cst_61 = arith.constant dense<0.000000e+00> : vector<4x128xf32>
    %356 = tpu.matmul %355, %257, %cst_61 {dimension_numbers = #tpu.dot_dimension_numbers<[1], [0], [0], [1], [0, 0, 1, 1], [], []>} : vector<4x64xf32>, vector<64x128xf32>, vector<4x128xf32> -> vector<4x128xf32>
    %357 = arith.addf %275, %356 : vector<4x128xf32>
    %358 = arith.mulf %357, %16 : vector<4x128xf32>
    %359 = arith.negf %358 : vector<4x128xf32>
    %360 = math.exp %359 : vector<4x128xf32>
    %cst_62 = arith.constant 1.000000e+00 : f32
    %361 = vector.broadcast %cst_62 : f32 to vector<4x128xf32>
    %362 = arith.addf %361, %360 : vector<4x128xf32>
    %363 = arith.divf %361, %362 : vector<4x128xf32>
    %364 = vector.extract_strided_slice %363 {offsets = [0, 0], sizes = [4, 32], strides = [1, 1]} : vector<4x128xf32> to vector<4x32xf32>
    %365 = vector.extract_strided_slice %363 {offsets = [0, 32], sizes = [4, 32], strides = [1, 1]} : vector<4x128xf32> to vector<4x32xf32>
    %366 = vector.extract_strided_slice %363 {offsets = [0, 64], sizes = [4, 32], strides = [1, 1]} : vector<4x128xf32> to vector<4x32xf32>
    %cst_63 = arith.constant 2.000000e+00 : f32
    %367 = vector.broadcast %cst_63 : f32 to vector<4x32xf32>
    %368 = arith.mulf %367, %366 : vector<4x32xf32>
    %cst_64 = arith.constant 1.000000e+00 : f32
    %369 = vector.broadcast %cst_64 : f32 to vector<4x32xf32>
    %370 = arith.subf %368, %369 : vector<4x32xf32>
    %371 = vector.extract_strided_slice %363 {offsets = [0, 96], sizes = [4, 32], strides = [1, 1]} : vector<4x128xf32> to vector<4x32xf32>
    %372 = arith.mulf %365, %351 : vector<4x32xf32>
    %373 = arith.mulf %364, %370 : vector<4x32xf32>
    %374 = arith.addf %372, %373 : vector<4x32xf32>
    %375 = math.tanh %374 : vector<4x32xf32>
    %376 = arith.mulf %371, %375 : vector<4x32xf32>
    %377 = tpu.concatenate %376, %376 in 1 : vector<4x32xf32>, vector<4x32xf32> -> vector<4x64xf32>
    %378 = arith.mulf %377, %7 : vector<4x64xf32>
    %cst_65 = arith.constant dense<0.000000e+00> : vector<4x128xf32>
    %379 = tpu.matmul %378, %257, %cst_65 {dimension_numbers = #tpu.dot_dimension_numbers<[1], [0], [0], [1], [0, 0, 1, 1], [], []>} : vector<4x64xf32>, vector<64x128xf32>, vector<4x128xf32> -> vector<4x128xf32>
    %380 = arith.addf %278, %379 : vector<4x128xf32>
    %381 = arith.mulf %380, %16 : vector<4x128xf32>
    %382 = arith.negf %381 : vector<4x128xf32>
    %383 = math.exp %382 : vector<4x128xf32>
    %cst_66 = arith.constant 1.000000e+00 : f32
    %384 = vector.broadcast %cst_66 : f32 to vector<4x128xf32>
    %385 = arith.addf %384, %383 : vector<4x128xf32>
    %386 = arith.divf %384, %385 : vector<4x128xf32>
    %387 = vector.extract_strided_slice %386 {offsets = [0, 0], sizes = [4, 32], strides = [1, 1]} : vector<4x128xf32> to vector<4x32xf32>
    %388 = vector.extract_strided_slice %386 {offsets = [0, 32], sizes = [4, 32], strides = [1, 1]} : vector<4x128xf32> to vector<4x32xf32>
    %389 = vector.extract_strided_slice %386 {offsets = [0, 64], sizes = [4, 32], strides = [1, 1]} : vector<4x128xf32> to vector<4x32xf32>
    %cst_67 = arith.constant 2.000000e+00 : f32
    %390 = vector.broadcast %cst_67 : f32 to vector<4x32xf32>
    %391 = arith.mulf %390, %389 : vector<4x32xf32>
    %cst_68 = arith.constant 1.000000e+00 : f32
    %392 = vector.broadcast %cst_68 : f32 to vector<4x32xf32>
    %393 = arith.subf %391, %392 : vector<4x32xf32>
    %394 = vector.extract_strided_slice %386 {offsets = [0, 96], sizes = [4, 32], strides = [1, 1]} : vector<4x128xf32> to vector<4x32xf32>
    %395 = arith.mulf %388, %374 : vector<4x32xf32>
    %396 = arith.mulf %387, %393 : vector<4x32xf32>
    %397 = arith.addf %395, %396 : vector<4x32xf32>
    %398 = math.tanh %397 : vector<4x32xf32>
    %399 = arith.mulf %394, %398 : vector<4x32xf32>
    %400 = tpu.concatenate %399, %399 in 1 : vector<4x32xf32>, vector<4x32xf32> -> vector<4x64xf32>
    %401 = arith.mulf %400, %7 : vector<4x64xf32>
    %cst_69 = arith.constant dense<0.000000e+00> : vector<4x128xf32>
    %402 = tpu.matmul %401, %257, %cst_69 {dimension_numbers = #tpu.dot_dimension_numbers<[1], [0], [0], [1], [0, 0, 1, 1], [], []>} : vector<4x64xf32>, vector<64x128xf32>, vector<4x128xf32> -> vector<4x128xf32>
    %403 = arith.addf %281, %402 : vector<4x128xf32>
    %404 = arith.mulf %403, %16 : vector<4x128xf32>
    %405 = arith.negf %404 : vector<4x128xf32>
    %406 = math.exp %405 : vector<4x128xf32>
    %cst_70 = arith.constant 1.000000e+00 : f32
    %407 = vector.broadcast %cst_70 : f32 to vector<4x128xf32>
    %408 = arith.addf %407, %406 : vector<4x128xf32>
    %409 = arith.divf %407, %408 : vector<4x128xf32>
    %410 = vector.extract_strided_slice %409 {offsets = [0, 0], sizes = [4, 32], strides = [1, 1]} : vector<4x128xf32> to vector<4x32xf32>
    %411 = vector.extract_strided_slice %409 {offsets = [0, 32], sizes = [4, 32], strides = [1, 1]} : vector<4x128xf32> to vector<4x32xf32>
    %412 = vector.extract_strided_slice %409 {offsets = [0, 64], sizes = [4, 32], strides = [1, 1]} : vector<4x128xf32> to vector<4x32xf32>
    %cst_71 = arith.constant 2.000000e+00 : f32
    %413 = vector.broadcast %cst_71 : f32 to vector<4x32xf32>
    %414 = arith.mulf %413, %412 : vector<4x32xf32>
    %cst_72 = arith.constant 1.000000e+00 : f32
    %415 = vector.broadcast %cst_72 : f32 to vector<4x32xf32>
    %416 = arith.subf %414, %415 : vector<4x32xf32>
    %417 = vector.extract_strided_slice %409 {offsets = [0, 96], sizes = [4, 32], strides = [1, 1]} : vector<4x128xf32> to vector<4x32xf32>
    %418 = arith.mulf %411, %397 : vector<4x32xf32>
    %419 = arith.mulf %410, %416 : vector<4x32xf32>
    %420 = arith.addf %418, %419 : vector<4x32xf32>
    %421 = math.tanh %420 : vector<4x32xf32>
    %422 = arith.mulf %417, %421 : vector<4x32xf32>
    %423 = tpu.concatenate %422, %422 in 1 : vector<4x32xf32>, vector<4x32xf32> -> vector<4x64xf32>
    %424 = arith.mulf %423, %7 : vector<4x64xf32>
    %cst_73 = arith.constant dense<0.000000e+00> : vector<4x128xf32>
    %425 = tpu.matmul %424, %257, %cst_73 {dimension_numbers = #tpu.dot_dimension_numbers<[1], [0], [0], [1], [0, 0, 1, 1], [], []>} : vector<4x64xf32>, vector<64x128xf32>, vector<4x128xf32> -> vector<4x128xf32>
    %426 = arith.addf %284, %425 : vector<4x128xf32>
    %427 = arith.mulf %426, %16 : vector<4x128xf32>
    %428 = arith.negf %427 : vector<4x128xf32>
    %429 = math.exp %428 : vector<4x128xf32>
    %cst_74 = arith.constant 1.000000e+00 : f32
    %430 = vector.broadcast %cst_74 : f32 to vector<4x128xf32>
    %431 = arith.addf %430, %429 : vector<4x128xf32>
    %432 = arith.divf %430, %431 : vector<4x128xf32>
    %433 = vector.extract_strided_slice %432 {offsets = [0, 0], sizes = [4, 32], strides = [1, 1]} : vector<4x128xf32> to vector<4x32xf32>
    %434 = vector.extract_strided_slice %432 {offsets = [0, 32], sizes = [4, 32], strides = [1, 1]} : vector<4x128xf32> to vector<4x32xf32>
    %435 = vector.extract_strided_slice %432 {offsets = [0, 64], sizes = [4, 32], strides = [1, 1]} : vector<4x128xf32> to vector<4x32xf32>
    %cst_75 = arith.constant 2.000000e+00 : f32
    %436 = vector.broadcast %cst_75 : f32 to vector<4x32xf32>
    %437 = arith.mulf %436, %435 : vector<4x32xf32>
    %cst_76 = arith.constant 1.000000e+00 : f32
    %438 = vector.broadcast %cst_76 : f32 to vector<4x32xf32>
    %439 = arith.subf %437, %438 : vector<4x32xf32>
    %440 = vector.extract_strided_slice %432 {offsets = [0, 96], sizes = [4, 32], strides = [1, 1]} : vector<4x128xf32> to vector<4x32xf32>
    %441 = arith.mulf %434, %420 : vector<4x32xf32>
    %442 = arith.mulf %433, %439 : vector<4x32xf32>
    %443 = arith.addf %441, %442 : vector<4x32xf32>
    %444 = math.tanh %443 : vector<4x32xf32>
    %445 = arith.mulf %440, %444 : vector<4x32xf32>
    %446 = tpu.concatenate %445, %445 in 1 : vector<4x32xf32>, vector<4x32xf32> -> vector<4x64xf32>
    %447 = arith.mulf %446, %7 : vector<4x64xf32>
    %cst_77 = arith.constant dense<0.000000e+00> : vector<4x128xf32>
    %448 = tpu.matmul %447, %257, %cst_77 {dimension_numbers = #tpu.dot_dimension_numbers<[1], [0], [0], [1], [0, 0, 1, 1], [], []>} : vector<4x64xf32>, vector<64x128xf32>, vector<4x128xf32> -> vector<4x128xf32>
    %449 = arith.addf %287, %448 : vector<4x128xf32>
    %450 = arith.mulf %449, %16 : vector<4x128xf32>
    %451 = arith.negf %450 : vector<4x128xf32>
    %452 = math.exp %451 : vector<4x128xf32>
    %cst_78 = arith.constant 1.000000e+00 : f32
    %453 = vector.broadcast %cst_78 : f32 to vector<4x128xf32>
    %454 = arith.addf %453, %452 : vector<4x128xf32>
    %455 = arith.divf %453, %454 : vector<4x128xf32>
    %456 = vector.extract_strided_slice %455 {offsets = [0, 0], sizes = [4, 32], strides = [1, 1]} : vector<4x128xf32> to vector<4x32xf32>
    %457 = vector.extract_strided_slice %455 {offsets = [0, 32], sizes = [4, 32], strides = [1, 1]} : vector<4x128xf32> to vector<4x32xf32>
    %458 = vector.extract_strided_slice %455 {offsets = [0, 64], sizes = [4, 32], strides = [1, 1]} : vector<4x128xf32> to vector<4x32xf32>
    %cst_79 = arith.constant 2.000000e+00 : f32
    %459 = vector.broadcast %cst_79 : f32 to vector<4x32xf32>
    %460 = arith.mulf %459, %458 : vector<4x32xf32>
    %cst_80 = arith.constant 1.000000e+00 : f32
    %461 = vector.broadcast %cst_80 : f32 to vector<4x32xf32>
    %462 = arith.subf %460, %461 : vector<4x32xf32>
    %463 = vector.extract_strided_slice %455 {offsets = [0, 96], sizes = [4, 32], strides = [1, 1]} : vector<4x128xf32> to vector<4x32xf32>
    %464 = arith.mulf %457, %443 : vector<4x32xf32>
    %465 = arith.mulf %456, %462 : vector<4x32xf32>
    %466 = arith.addf %464, %465 : vector<4x32xf32>
    %467 = math.tanh %466 : vector<4x32xf32>
    %468 = arith.mulf %463, %467 : vector<4x32xf32>
    %469 = vector.extract_strided_slice %468 {offsets = [0, 0], sizes = [2, 32], strides = [1, 1]} : vector<4x32xf32> to vector<2x32xf32>
    %470 = vector.extract_strided_slice %307 {offsets = [2, 0], sizes = [2, 32], strides = [1, 1]} : vector<4x32xf32> to vector<2x32xf32>
    %471 = tpu.concatenate %469, %470 in 1 : vector<2x32xf32>, vector<2x32xf32> -> vector<2x64xf32>
    %c0_81 = arith.constant 0 : index
    %c0_82 = arith.constant 0 : index
    %472 = vector.load %arg7[%c0_81, %c0_82] : memref<64x10xf32, #tpu.memory_space<vmem>>, vector<64x10xf32>
    %cst_83 = arith.constant dense<0.000000e+00> : vector<2x10xf32>
    %473 = tpu.matmul %471, %472, %cst_83 {dimension_numbers = #tpu.dot_dimension_numbers<[1], [0], [0], [1], [0, 0, 1, 1], [], []>} : vector<2x64xf32>, vector<64x10xf32>, vector<2x10xf32> -> vector<2x10xf32>
    %c0_84 = arith.constant 0 : index
    %c0_85 = arith.constant 0 : index
    %474 = vector.load %arg8[%c0_84, %c0_85] : memref<1x10xf32, #tpu.memory_space<vmem>>, vector<1x10xf32>
    %475 = vector.broadcast %474 : vector<1x10xf32> to vector<2x10xf32>
    %476 = arith.addf %473, %475 : vector<2x10xf32>
    %c0_86 = arith.constant 0 : index
    %c0_87 = arith.constant 0 : index
    %477 = vector.load %arg9[%c0_86, %c0_87] : memref<2x10xf32, #tpu.memory_space<vmem>>, vector<2x10xf32>
    tpu.vector_store %arg9[%c0_86, %c0_87], %476 {strides = array<i32>} : memref<2x10xf32, #tpu.memory_space<vmem>>, vector<2x10xf32>,
    return
  }
}

</mosaic_0001>

<bundles_post_ra>
// kernel: bilstm_forward.1
= control target key start
LH: loop header
LB: loop body
LE: loop exit
PB: predicated region body
PF: predicated region fallthrough
CT: control target
= control target key end

     0   :  { %14 = vsyncpa [#allocation3], 0  ;;  %s2262_s0 = inlined_call_operand.vmem [shape: f32[16,28], index: 0, kind: input, shape index: {}]   ;;  %s2263_s1 = inlined_call_operand.vmem [shape: f32[28,256], index: 1, kind: input, shape index: {}]   ;;  %s2264_s2 = inlined_call_operand.hbm [shape: f32[64,128], index: 2, kind: input, shape index: {}]   ;;  %s2265_s3 = inlined_call_operand.vmem [shape: f32[1,256], index: 3, kind: input, shape index: {}]   ;;  %s2266_s4 = inlined_call_operand.hbm [shape: f32[64,256], index: 4, kind: input, shape index: {}]   ;;  %s2267_s5 = inlined_call_operand.hbm [shape: f32[64,128], index: 5, kind: input, shape index: {}]   ;;  %s2268_s6 = inlined_call_operand.vmem [shape: f32[1,256], index: 6, kind: input, shape index: {}]   ;;  %s2269_s7 = inlined_call_operand.vmem [shape: f32[64,10], index: 7, kind: input, shape index: {}]   ;;  %s2270_s8 = inlined_call_operand.vmem [shape: f32[1,10], index: 8, kind: input, shape index: {}]   ;;  %s2271_s9 = inlined_call_operand.hbm [shape: f32[2,10], index: 9, kind: output, shape index: {}]  }
   0x1   :  { %15 = vsyncpa [#allocation6], 0  ;;  %s40_s11 = sshll.u32 %s2266_s4, 4  ;;  %s41_s11 = int_to_ptr.hbm [resolvable:$true] %s40_s11 }
   0x2   :  { %16 = vsyncpa [#allocation4], 0  ;;  %s1822_s12 = smov [#allocation5]   ;;  %s25_s16 = sshll.u32 %s2264_s2, 4  ;;  %s26_s16 = int_to_ptr.hbm [resolvable:$true] %s25_s16 }
   0x3   :  { %s42_s13 = sshll.u32 %s1822_s12, 4  ;;  %s1823_s17 = smov 256   ;;  %s43_s13 = int_to_ptr.vmem [resolvable:$true] %s42_s13 }
   0x4   :  { %s1824_s18 = smov 16   ;;  %s1825_s19 = smov [#allocation2]  }
   0x5   :  { %48 = dma.hbm_to_vmem [thread:$0]  %s41_s11, 2048, %s43_s13, [#allocation6], %s1823_s17, %s1823_s17, %s1824_s18  }
   0x6   :  { %s27_s20 = sshll.u32 %s1825_s19, 4  ;;  %s1826_s21 = smov 128   ;;  %s28_s20 = int_to_ptr.vmem [resolvable:$true] %s27_s20 }
   0x7   :  { %s1827_s22 = smov 8   ;;  %s53_s24 = sshll.u32 %s2267_s5, 4  ;;  %s54_s24 = int_to_ptr.hbm [resolvable:$true] %s53_s24 }
   0x8   :  { %33 = dma.hbm_to_vmem [thread:$0]  %s26_s16, 1024, %s28_s20, [#allocation3], %s1826_s21, %s1826_s21, %s1827_s22  }
   0x9   :  { %s1828_s25 = smov [#allocation7]  }
   0xa   :  { %s55_s26 = sshll.u32 %s1828_s25, 4  ;;  %s56_s26 = int_to_ptr.vmem [resolvable:$true] %s55_s26 }
   0xb   :  { %61 = dma.hbm_to_vmem [thread:$0]  %s54_s24, 1024, %s56_s26, [#allocation6], %s1826_s21, %s1826_s21, %s1827_s22  }
   0xc   :  { %1816 = dma.done.wait [#allocation3], 1024  }
   0xd   :  { %1817 = vsyncadd [#allocation3], 4294966272 }
   0xe   :  { %1818 = dma.done.wait [#allocation6], 3072  }
   0xf   :  { %1819 = vsyncadd [#allocation6], 4294964224  ;;  %vm125_vm0 = vcmask 1043456   ;;  %v102_v0 = vld [vmem:[%s2263_s1 + $0x30] sm:$0xf]  ;;  %v100_v2 = vld [vmem:[%s2263_s1 + $0x20] sm:$0xff]  ;;  %v80_v11 = vlaneseq }
  0x10   :  { %v103_v1 = vld [vmem:[%s2263_s1 + $0x38] sm:$0xf]  ;;  %1554 = vmatpush.msk.msra.mxu0 %vm125_vm0, %v102_v0  ;;  %v101_v3 = vld [vmem:[%s2263_s1 + $0x28] sm:$0xff]  ;;  %v98_v4 = vld [vmem:[%s2263_s1 + $0x10] sm:$0xff]  ;;  %vm118_vm1 = vcmask 228352   ;;  %vm181_vm5 = vcmask 1041408  }
  0x11   :  { %1557 = vmatpush.msk.msra.mxu1 %vm125_vm0, %v103_v1  ;;  %v99_v5 = vld [vmem:[%s2263_s1 + $0x18] sm:$0xff]  ;;  %v96_v6 = vld [vmem:[%s2263_s1] sm:$0xff]  ;;  %v97_v7 = vld [vmem:[%s2263_s1 + $0x8] sm:$0xff]  ;;  %v89_v16 = vand.u32 127, %v80_v11  ;;  %v1829_v26 = vmov 1.0   ;;  %s1831_s1 = smov 32  }
  0x12   :  { %145 = vmatpush.msra.mxu0 %v100_v2  ;;  %v94_v8 = vld [vmem:[%s2262_s0] sm:$0xff]  ;;  %v95_v9 = vld [vmem:[%s2262_s0 + $0x8] sm:$0xff]  ;;  %s1830_s0 = smov 64   ;;  %vm86_vm11 = vcmask 261120   ;;  %vm263_vm12 = vcmask 523264   ;;  %s1833_s20 = smov [#allocation8]  }
  0x13   :  { %168 = vmatpush.msra.mxu1 %v101_v3  ;;  %v112_v10 = vld [vmem:[%s2265_s3] sm:$0x3]  ;;  %vm90_vm2 = vcmp.ge.s32.totalorder %v89_v16, 64  ;;  %vm91_vm3 = vcmp.lt.s32.totalorder %v89_v16, 96  ;;  %s1540_s21 = sshll.u32 %s1833_s20, 4  ;;  %s1542_s23 = sshll.u32 %s2271_s9, 4  ;;  %s1541_s21 = int_to_ptr.vmem [resolvable:$true] %s1540_s21  ;;  %s1543_s23 = int_to_ptr.hbm [resolvable:$true] %s1542_s23 }
  0x14   :  { %146 = vmatpush.msra.mxu0 %v98_v4  ;;  %v115_v12 = vperm.slane %v112_v10, 1  ;;  %v114_v13 = vperm.slane %v112_v10, 0  ;;  %vm92_vm4 = vmand %vm90_vm2, %vm91_vm3  ;;  %v106_v10 = vld [vmem:[#allocation2 + $0x10] sm:$0xff] }
  0x15   :  { %169 = vmatpush.msra.mxu1 %v99_v5  ;;  %v1929_v27 = vsel %vm92_vm4, 2.0, %v1829_v26  ;;  %v111_v5 = vld [vmem:[#allocation2 + $0x38] sm:$0xff] }
  0x16   :  { %147 = vmatpush.msra.mxu0 %v96_v6  ;;  %v110_v6 = vld [vmem:[#allocation2 + $0x30] sm:$0xff]  ;;  %275 = vmatpush.msra.mxu2 %v111_v5 }
  0x17   :  { %170 = vmatpush.msra.mxu1 %v97_v7  ;;  %1555 = vmatmul.msk.f32.vlgmr.msra.gmra.mxu0 %vm118_vm1, %v94_v8  ;;  %v109_v7 = vld [vmem:[#allocation2 + $0x28] sm:$0xff] }
  0x18   :  { %1558 = vmatmul.msk.f32.vlgmr.msra.gmra.mxu1 %vm118_vm1, %v94_v8  ;;  %347 = vmatpush.msra.mxu3 %v111_v5  ;;  %v108_v8 = vld [vmem:[#allocation2 + $0x20] sm:$0xff] }
  0x19   :  { %419 = vmatpush.msrb.mxu0 %v111_v5  ;;  %491 = vmatpush.msrb.mxu1 %v111_v5 }
  0x1a   :  { %276 = vmatpush.msra.mxu2 %v110_v6  ;;  %348 = vmatpush.msra.mxu3 %v110_v6 }
  0x1b   :  { %420 = vmatpush.msrb.mxu0 %v110_v6  ;;  %492 = vmatpush.msrb.mxu1 %v110_v6 }
  0x1c   :  { %277 = vmatpush.msra.mxu2 %v109_v7  ;;  %349 = vmatpush.msra.mxu3 %v109_v7 }
  0x1d   :  { %421 = vmatpush.msrb.mxu0 %v109_v7  ;;  %493 = vmatpush.msrb.mxu1 %v109_v7 }
  0x1e   :  { %278 = vmatpush.msra.mxu2 %v108_v8  ;;  %350 = vmatpush.msra.mxu3 %v108_v8 }
  0x1f   :  { %1556 = vmatmul.msk.f32.gmra.mxu0 %vm118_vm1, %v95_v9  ;;  %494 = vmatpush.msrb.mxu1 %v108_v8 }
  0x20   :  { %1559 = vmatmul.msk.f32.gmra.mxu1 %vm118_vm1, %v95_v9  ;;  %v107_v9 = vld [vmem:[#allocation2 + $0x18] sm:$0xff]  ;;  %422 = vmatpush.msrb.mxu0 %v108_v8 }
  0x21   :  { %279 = vmatpush.msra.mxu2 %v107_v9  ;;  %351 = vmatpush.msra.mxu3 %v107_v9 }
  0x22   :  { %423 = vmatpush.msrb.mxu0 %v107_v9  ;;  %495 = vmatpush.msrb.mxu1 %v107_v9 }
  0x23   :  { %280 = vmatpush.msra.mxu2 %v106_v10  ;;  %352 = vmatpush.msra.mxu3 %v106_v10 }
  0x24   :  { %424 = vmatpush.msrb.mxu0 %v106_v10  ;;  %496 = vmatpush.msrb.mxu1 %v106_v10 }
  0x94   :  { %v149_v14 = vpop.f32.mrf.mxu0 }
  0x95   :  { %v172_v15 = vpop.f32.mrf.mxu1  ;;  %v150_v18 = vadd.f32 %v149_v14, %v114_v13  ;;  %v81_v14 = vshrl.u32 %v80_v11, 7 }
  0x96   :  { %v173_v17 = vadd.f32 %v172_v15, %v115_v12  ;;  %v1832_v15 = vmov 0.0  }
  0x97   :  { %v189_v19 = vrot.slane %v150_v18, 4  ;;  %v184_v24 = vrot.slane %v150_v18, 2  ;;  %v192_v25 = vrot.slane %v150_v18, 6  ;;  %vm82_vm10 = vcmp.lt.s32.totalorder %v81_v14, 2 }
  0x98   :  { %v198_v28 = vrot.slane %v173_v17, 4  ;;  %v204_v29 = vrot.slane %v173_v17, 2  ;;  %v212_v30 = vrot.slane %v173_v17, 6  ;;  %v1553_v16 = vsel %vm82_vm10, 1.0, %v1832_v15 }
  0x9c   :  { %v152_v20 = vpop.f32.mrf.mxu0 }
  0x9d   :  { %v175_v21 = vpop.f32.mrf.mxu1  ;;  %v153_v22 = vadd.f32 %v152_v20, %v114_v13  ;;  %v104_v13 = vld [vmem:[#allocation2] sm:$0xff] }
  0x9e   :  { %v176_v23 = vadd.f32 %v175_v21, %v115_v12  ;;  %v105_v12 = vld [vmem:[#allocation2 + $0x8] sm:$0xff] }
  0x9f   :  { %v1935_v35 = vsel %vm181_vm5, %v153_v22, %v198_v28  ;;  %v202_v36 = vrot.slane %v153_v22, 2  ;;  %v207_v37 = vrot.slane %v153_v22, 4  ;;  %v210_v38 = vrot.slane %v153_v22, 6  ;;  %281 = vmatpush.msra.mxu2 %v105_v12  ;;  %353 = vmatpush.msra.mxu3 %v105_v12 }
  0xa0   :  { %v179_v31 = vrot.slane %v176_v23, 4  ;;  %v186_v32 = vrot.slane %v176_v23, 2  ;;  %v1932_v33 = vsel %vm181_vm5, %v189_v19, %v176_v23  ;;  %v194_v34 = vrot.slane %v176_v23, 6  ;;  %425 = vmatpush.msrb.mxu0 %v105_v12  ;;  %497 = vmatpush.msrb.mxu1 %v105_v12 }
  0xa1   :  { %v1946_v43 = vsel %vm181_vm5, %v202_v36, %v204_v29  ;;  %v1949_v44 = vsel %vm181_vm5, %v207_v37, %v173_v17  ;;  %v1952_v45 = vsel %vm181_vm5, %v210_v38, %v212_v30  ;;  %282 = vmatpush.msra.mxu2 %v104_v13  ;;  %354 = vmatpush.msra.mxu3 %v104_v13  ;;  %v85_v17 = vsub.f32 1.0, %v1553_v16 }
  0xa2   :  { %v182_v39 = vsel %vm181_vm5, %v150_v18, %v179_v31  ;;  %v1939_v40 = vsel %vm181_vm5, %v184_v24, %v186_v32  ;;  %v1942_v41 = vsel %vm181_vm5, %v192_v25, %v194_v34  ;;  %426 = vmatpush.msrb.mxu0 %v104_v13  ;;  %498 = vmatpush.msrb.mxu1 %v104_v13 }
  0xa3   :  { %v215_v42 = vmul.f32 %v182_v39, %v1929_v27  ;;  %563 = vmatpush.msrb.mxu2 %v111_v5  ;;  %635 = vmatpush.msrb.mxu3 %v111_v5  ;;  %v1968_v18 = vsel %vm86_vm11, %v1553_v16, %v85_v17 }
  0xa4   :  { %707 = vmatpush.msra.mxu0 %v111_v5 }
  0xa5   :  { %v1560_v46 = vmul.f32 -1.442695, %v215_v42  ;;  %564 = vmatpush.msrb.mxu2 %v110_v6  ;;  %636 = vmatpush.msrb.mxu3 %v110_v6 }
  0xa6   :  { %708 = vmatpush.msra.mxu0 %v110_v6 }
  0xa7   :  { %1624 = vpow2.f32 %v1560_v46  ;;  %565 = vmatpush.msrb.mxu2 %v109_v7  ;;  %637 = vmatpush.msrb.mxu3 %v109_v7 }
  0xa8   :  { %709 = vmatpush.msra.mxu0 %v109_v7 }
  0xa9   :  { %566 = vmatpush.msrb.mxu2 %v108_v8  ;;  %638 = vmatpush.msrb.mxu3 %v108_v8 }
  0xaa   :  { %710 = vmatpush.msra.mxu0 %v108_v8 }
  0xab   :  { %567 = vmatpush.msrb.mxu2 %v107_v9  ;;  %639 = vmatpush.msrb.mxu3 %v107_v9 }
  0xac   :  { %711 = vmatpush.msra.mxu0 %v107_v9 }
  0xad   :  { %v1625_v47 = vpop.eup %1624  ;;  %568 = vmatpush.msrb.mxu2 %v106_v10  ;;  %640 = vmatpush.msrb.mxu3 %v106_v10 }
  0xae   :  { %v219_v48 = vadd.f32 1.0, %v1625_v47  ;;  %712 = vmatpush.msra.mxu0 %v106_v10 }
  0xaf   :  { %569 = vmatpush.msrb.mxu2 %v105_v12  ;;  %641 = vmatpush.msrb.mxu3 %v105_v12 }
  0xb0   :  { %1626 = vrcp.f32 %v219_v48  ;;  %v231_v52 = vand.u32 2147483648, %v219_v48  ;;  %v229_v54 = vand.u32 2147483647, %v219_v48  ;;  %vm225_vm7 = vweird.f32 %v219_v48  ;;  %713 = vmatpush.msra.mxu0 %v105_v12 }
  0xb1   :  { %570 = vmatpush.msrb.mxu2 %v104_v13  ;;  %642 = vmatpush.msrb.mxu3 %v104_v13 }
  0xb2   :  { %v232_v56 = vor.u32 1.1754944e-38, %v231_v52  ;;  %vm230_vm9 = vcmp.eq.f32.partialorder %v229_v54, 8.507059e+37  ;;  %714 = vmatpush.msra.mxu0 %v104_v13 }
  0xb6   :  { %v1627_v49 = vpop.eup %1626 }
  0xb7   :  { %v221_v50 = vmul.f32 %v1627_v49, %v219_v48  ;;  %vm226_vm6 = vweird.f32 %v1627_v49 }
  0xb8   :  { %vm227_vm8 = vmor %vm225_vm7, %vm226_vm6 }
  0xb9   :  { %v222_v51 = vsub.f32 1.0, %v221_v50 }
  0xbb   :  { %v223_v53 = vmul.f32 %v1627_v49, %v222_v51 }
  0xbd   :  { %v224_v55 = vadd.f32 %v1627_v49, %v223_v53 }
  0xbf   :  { %v228_v57 = vsel %vm227_vm8, %v1627_v49, %v224_v55 }
  0xc0   :  { %v233_v58 = vsel %vm230_vm9, %v232_v56, %v228_v57 }
  0xc1   :  { %v235_v59 = vmul.f32 2.0, %v233_v58  ;;  %v237_v63 = vmul.f32 0.0, %v233_v58 }
  0xc3   :  { %v1561_v60 = vadd.f32 -1.0, %v235_v59 }
  0xc5   :  { %239 = vrot.lane.b32.xlu0 %v1561_v60, %s1830_s0 }
 0x137   :  { %v240_v61 = vpop.permute.xlu0 %239 }
 0x138   :  { %v242_v62 = vmul.f32 %v240_v61, %v233_v58 }
 0x13a   :  { %244 = vrot.lane.b32.xlu0 %v242_v62, %s1831_s1 }
 0x1ac   :  { %v245_v0 = vpop.permute.xlu0 %244 }
 0x1ad   :  { %v1956_v1 = vadd.f32 %v245_v0, %v237_v63 }
 0x1af   :  { %1628 = vtanh.f32 %v1956_v1 }
 0x1b5   :  { %v1629_v2 = vpop.eup %1628 }
 0x1b6   :  { %250 = vrot.lane.b32.xlu1 %v1629_v2, %s1830_s0 }
 0x228   :  { %v251_v3 = vpop.permute.xlu1 %250 }
 0x229   :  { %v1960_v4 = vmul.f32 %v251_v3, %v233_v58 }
 0x22b   :  { %258 = vrot.lane.b32.xlu2 %v1960_v4, %s1830_s0  ;;  %255 = vrot.lane.b32.xlu1 %v1960_v4, %s1831_s1 }
 0x285   :  { %v259_v19 = vpop.permute.xlu2 %258 }
 0x29d   :  { %v1970_v20 = vpop.permute.xlu1 %255 }
 0x29e   :  { %v261_v11 = vsel %vm86_vm11, %v1970_v20, %v259_v19 }
 0x29f   :  { %v262_v21 = vmul.f32 %v261_v11, %v1968_v18 }
 0x2a1   :  { %1562 = vmatmul.msk.f32.vlgmr.msra.gmra.mxu2 %vm263_vm12, %v262_v21 }
 0x324   :  { %v284_v22 = vpop.f32.mrf.mxu2 }
 0x325   :  { %v287_v23 = vadd.f32 %v284_v22, %v1939_v40 }
 0x327   :  { %v288_v24 = vmul.f32 %v287_v23, %v1929_v27 }
 0x329   :  { %v1563_v25 = vmul.f32 -1.442695, %v288_v24 }
 0x32b   :  { %1630 = vpow2.f32 %v1563_v25 }
 0x331   :  { %v1631_v26 = vpop.eup %1630 }
 0x332   :  { %v292_v28 = vadd.f32 1.0, %v1631_v26 }
 0x334   :  { %1632 = vrcp.f32 %v292_v28  ;;  %v304_v32 = vand.u32 2147483648, %v292_v28  ;;  %v302_v36 = vand.u32 2147483647, %v292_v28  ;;  %vm298_vm14 = vweird.f32 %v292_v28 }
 0x336   :  { %v305_v38 = vor.u32 1.1754944e-38, %v304_v32  ;;  %vm303_vm1 = vcmp.eq.f32.partialorder %v302_v36, 8.507059e+37 }
 0x33a   :  { %v1633_v29 = vpop.eup %1632 }
 0x33b   :  { %v294_v30 = vmul.f32 %v1633_v29, %v292_v28  ;;  %vm299_vm13 = vweird.f32 %v1633_v29 }
 0x33c   :  { %vm300_vm15 = vmor %vm298_vm14, %vm299_vm13 }
 0x33d   :  { %v295_v31 = vsub.f32 1.0, %v294_v30 }
 0x33f   :  { %v296_v34 = vmul.f32 %v1633_v29, %v295_v31 }
 0x341   :  { %v297_v37 = vadd.f32 %v1633_v29, %v296_v34 }
 0x343   :  { %v301_v39 = vsel %vm300_vm15, %v1633_v29, %v297_v37 }
 0x344   :  { %v306_v40 = vsel %vm303_vm1, %v305_v38, %v301_v39 }
 0x345   :  { %v308_v42 = vmul.f32 2.0, %v306_v40  ;;  %v310_v49 = vmul.f32 %v306_v40, %v1956_v1 }
 0x347   :  { %v1564_v46 = vadd.f32 -1.0, %v308_v42 }
 0x349   :  { %312 = vrot.lane.b32.xlu2 %v1564_v46, %s1830_s0 }
 0x3a3   :  { %v313_v47 = vpop.permute.xlu2 %312 }
 0x3a4   :  { %v315_v48 = vmul.f32 %v313_v47, %v306_v40 }
 0x3a6   :  { %317 = vrot.lane.b32.xlu0 %v315_v48, %s1831_s1 }
 0x418   :  { %v318_v50 = vpop.permute.xlu0 %317 }
 0x419   :  { %v320_v51 = vadd.f32 %v318_v50, %v310_v49 }
 0x41b   :  { %1634 = vtanh.f32 %v320_v51 }
 0x421   :  { %v1635_v52 = vpop.eup %1634 }
 0x422   :  { %323 = vrot.lane.b32.xlu1 %v1635_v52, %s1830_s0 }
 0x494   :  { %v324_v53 = vpop.permute.xlu1 %323 }
 0x495   :  { %v1982_v54 = vmul.f32 %v324_v53, %v306_v40 }
 0x497   :  { %331 = vrot.lane.b32.xlu0 %v1982_v54, %s1830_s0  ;;  %328 = vrot.lane.b32.xlu2 %v1982_v54, %s1831_s1 }
 0x4f1   :  { %v1988_v55 = vpop.permute.xlu2 %328 }
 0x509   :  { %v332_v56 = vpop.permute.xlu0 %331 }
 0x50a   :  { %v334_v57 = vsel %vm86_vm11, %v1988_v55, %v332_v56 }
 0x50b   :  { %v335_v58 = vmul.f32 %v334_v57, %v1968_v18 }
 0x50d   :  { %1565 = vmatmul.msk.f32.vlgmr.msra.gmra.mxu3 %vm263_vm12, %v335_v58 }
 0x590   :  { %v356_v59 = vpop.f32.mrf.mxu3 }
 0x591   :  { %v359_v60 = vadd.f32 %v356_v59, %v1932_v33 }
 0x593   :  { %v360_v61 = vmul.f32 %v359_v60, %v1929_v27 }
 0x595   :  { %v1566_v62 = vmul.f32 -1.442695, %v360_v61 }
 0x597   :  { %1636 = vpow2.f32 %v1566_v62 }
 0x59d   :  { %v1637_v63 = vpop.eup %1636 }
 0x59e   :  { %v364_v0 = vadd.f32 1.0, %v1637_v63 }
 0x5a0   :  { %1638 = vrcp.f32 %v364_v0  ;;  %v376_v5 = vand.u32 2147483648, %v364_v0  ;;  %v374_v7 = vand.u32 2147483647, %v364_v0  ;;  %vm370_vm3 = vweird.f32 %v364_v0 }
 0x5a2   :  { %v377_v9 = vor.u32 1.1754944e-38, %v376_v5  ;;  %vm375_vm6 = vcmp.eq.f32.partialorder %v374_v7, 8.507059e+37 }
 0x5a6   :  { %v1639_v1 = vpop.eup %1638 }
 0x5a7   :  { %v366_v2 = vmul.f32 %v1639_v1, %v364_v0  ;;  %vm371_vm2 = vweird.f32 %v1639_v1 }
 0x5a8   :  { %vm372_vm4 = vmor %vm370_vm3, %vm371_vm2 }
 0x5a9   :  { %v367_v3 = vsub.f32 1.0, %v366_v2 }
 0x5ab   :  { %v368_v6 = vmul.f32 %v1639_v1, %v367_v3 }
 0x5ad   :  { %v369_v8 = vadd.f32 %v1639_v1, %v368_v6 }
 0x5af   :  { %v373_v10 = vsel %vm372_vm4, %v1639_v1, %v369_v8 }
 0x5b0   :  { %v378_v33 = vsel %vm375_vm6, %v377_v9, %v373_v10 }
 0x5b1   :  { %v380_v12 = vmul.f32 2.0, %v378_v33  ;;  %v382_v16 = vmul.f32 %v378_v33, %v320_v51 }
 0x5b3   :  { %v1567_v13 = vadd.f32 -1.0, %v380_v12 }
 0x5b5   :  { %384 = vrot.lane.b32.xlu1 %v1567_v13, %s1830_s0 }
 0x627   :  { %v385_v14 = vpop.permute.xlu1 %384 }
 0x628   :  { %v387_v15 = vmul.f32 %v385_v14, %v378_v33 }
 0x62a   :  { %389 = vrot.lane.b32.xlu2 %v387_v15, %s1831_s1 }
 0x684   :  { %v390_v17 = vpop.permute.xlu2 %389 }
 0x685   :  { %v392_v19 = vadd.f32 %v390_v17, %v382_v16 }
 0x687   :  { %1640 = vtanh.f32 %v392_v19 }
 0x68d   :  { %v1641_v11 = vpop.eup %1640 }
 0x68e   :  { %395 = vrot.lane.b32.xlu0 %v1641_v11, %s1830_s0 }
 0x700   :  { %v396_v21 = vpop.permute.xlu0 %395 }
 0x701   :  { %v1999_v22 = vmul.f32 %v396_v21, %v378_v33 }
 0x703   :  { %403 = vrot.lane.b32.xlu2 %v1999_v22, %s1830_s0  ;;  %400 = vrot.lane.b32.xlu1 %v1999_v22, %s1831_s1 }
 0x75d   :  { %v404_v23 = vpop.permute.xlu2 %403 }
 0x775   :  { %v2005_v24 = vpop.permute.xlu1 %400 }
 0x776   :  { %v406_v25 = vsel %vm86_vm11, %v2005_v24, %v404_v23 }
 0x777   :  { %v407_v26 = vmul.f32 %v406_v25, %v1968_v18 }
 0x779   :  { %1568 = vmatmul.msk.f32.vlgmr.msrb.gmra.mxu0 %vm263_vm12, %v407_v26 }
 0x7f6   :  { %v428_v28 = vpop.f32.mrf.mxu0 }
 0x7f7   :  { %v431_v29 = vadd.f32 %v428_v28, %v1942_v41 }
 0x7f9   :  { %v432_v30 = vmul.f32 %v431_v29, %v1929_v27 }
 0x7fb   :  { %v1569_v31 = vmul.f32 -1.442695, %v432_v30 }
 0x7fd   :  { %1642 = vpow2.f32 %v1569_v31 }
 0x803   :  { %v1643_v32 = vpop.eup %1642 }
 0x804   :  { %v436_v34 = vadd.f32 1.0, %v1643_v32 }
 0x806   :  { %1644 = vrcp.f32 %v436_v34  ;;  %v448_v39 = vand.u32 2147483648, %v436_v34  ;;  %v446_v42 = vand.u32 2147483647, %v436_v34  ;;  %vm442_vm8 = vweird.f32 %v436_v34 }
 0x808   :  { %v449_v47 = vor.u32 1.1754944e-38, %v448_v39  ;;  %vm447_vm10 = vcmp.eq.f32.partialorder %v446_v42, 8.507059e+37 }
 0x80c   :  { %v1645_v36 = vpop.eup %1644 }
 0x80d   :  { %v438_v37 = vmul.f32 %v1645_v36, %v436_v34  ;;  %vm443_vm7 = vweird.f32 %v1645_v36 }
 0x80e   :  { %vm444_vm9 = vmor %vm442_vm8, %vm443_vm7 }
 0x80f   :  { %v439_v38 = vsub.f32 1.0, %v438_v37 }
 0x811   :  { %v440_v40 = vmul.f32 %v1645_v36, %v439_v38 }
 0x813   :  { %v441_v46 = vadd.f32 %v1645_v36, %v440_v40 }
 0x815   :  { %v445_v48 = vsel %vm444_vm9, %v1645_v36, %v441_v46 }
 0x816   :  { %v450_v41 = vsel %vm447_vm10, %v449_v47, %v445_v48 }
 0x817   :  { %v452_v49 = vmul.f32 2.0, %v450_v41  ;;  %v454_v53 = vmul.f32 %v450_v41, %v392_v19 }
 0x819   :  { %v1570_v50 = vadd.f32 -1.0, %v452_v49 }
 0x81b   :  { %456 = vrot.lane.b32.xlu0 %v1570_v50, %s1830_s0 }
 0x88d   :  { %v457_v51 = vpop.permute.xlu0 %456 }
 0x88e   :  { %v459_v52 = vmul.f32 %v457_v51, %v450_v41 }
 0x890   :  { %461 = vrot.lane.b32.xlu1 %v459_v52, %s1831_s1 }
 0x902   :  { %v462_v56 = vpop.permute.xlu1 %461 }
 0x903   :  { %v464_v57 = vadd.f32 %v462_v56, %v454_v53 }
 0x905   :  { %1646 = vtanh.f32 %v464_v57 }
 0x90b   :  { %v1647_v58 = vpop.eup %1646 }
 0x90c   :  { %467 = vrot.lane.b32.xlu2 %v1647_v58, %s1830_s0 }
 0x966   :  { %v468_v59 = vpop.permute.xlu2 %467 }
 0x967   :  { %v2016_v60 = vmul.f32 %v468_v59, %v450_v41 }
 0x969   :  { %475 = vrot.lane.b32.xlu1 %v2016_v60, %s1830_s0  ;;  %472 = vrot.lane.b32.xlu0 %v2016_v60, %s1831_s1 }
 0x9db   :  { %v476_v61 = vpop.permute.xlu1 %475  ;;  %v2022_v62 = vpop.permute.xlu0 %472 }
 0x9dc   :  { %v478_v63 = vsel %vm86_vm11, %v2022_v62, %v476_v61 }
 0x9dd   :  { %v479_v0 = vmul.f32 %v478_v63, %v1968_v18 }
 0x9df   :  { %1571 = vmatmul.msk.f32.vlgmr.msrb.gmra.mxu1 %vm263_vm12, %v479_v0 }
 0xa5c   :  { %v500_v1 = vpop.f32.mrf.mxu1 }
 0xa5d   :  { %v503_v2 = vadd.f32 %v500_v1, %v1935_v35 }
 0xa5f   :  { %v504_v3 = vmul.f32 %v503_v2, %v1929_v27 }
 0xa61   :  { %v1572_v5 = vmul.f32 -1.442695, %v504_v3 }
 0xa63   :  { %1648 = vpow2.f32 %v1572_v5 }
 0xa69   :  { %v1649_v6 = vpop.eup %1648 }
 0xa6a   :  { %v508_v7 = vadd.f32 1.0, %v1649_v6 }
 0xa6c   :  { %1650 = vrcp.f32 %v508_v7  ;;  %v520_v33 = vand.u32 2147483648, %v508_v7  ;;  %v518_v13 = vand.u32 2147483647, %v508_v7  ;;  %vm514_vm14 = vweird.f32 %v508_v7 }
 0xa6e   :  { %v521_v15 = vor.u32 1.1754944e-38, %v520_v33  ;;  %vm519_vm1 = vcmp.eq.f32.partialorder %v518_v13, 8.507059e+37 }
 0xa72   :  { %v1651_v8 = vpop.eup %1650 }
 0xa73   :  { %v510_v9 = vmul.f32 %v1651_v8, %v508_v7  ;;  %vm515_vm13 = vweird.f32 %v1651_v8 }
 0xa74   :  { %vm516_vm15 = vmor %vm514_vm14, %vm515_vm13 }
 0xa75   :  { %v511_v10 = vsub.f32 1.0, %v510_v9 }
 0xa77   :  { %v512_v12 = vmul.f32 %v1651_v8, %v511_v10 }
 0xa79   :  { %v513_v14 = vadd.f32 %v1651_v8, %v512_v12 }
 0xa7b   :  { %v517_v16 = vsel %vm516_vm15, %v1651_v8, %v513_v14 }
 0xa7c   :  { %v522_v35 = vsel %vm519_vm1, %v521_v15, %v517_v16 }
 0xa7d   :  { %v524_v17 = vmul.f32 2.0, %v522_v35  ;;  %v526_v23 = vmul.f32 %v522_v35, %v464_v57 }
 0xa7f   :  { %v1573_v19 = vadd.f32 -1.0, %v524_v17 }
 0xa81   :  { %528 = vrot.lane.b32.xlu2 %v1573_v19, %s1830_s0 }
 0xadb   :  { %v529_v11 = vpop.permute.xlu2 %528 }
 0xadc   :  { %v531_v21 = vmul.f32 %v529_v11, %v522_v35 }
 0xade   :  { %533 = vrot.lane.b32.xlu0 %v531_v21, %s1831_s1 }
 0xb50   :  { %v534_v25 = vpop.permute.xlu0 %533 }
 0xb51   :  { %v536_v26 = vadd.f32 %v534_v25, %v526_v23 }
 0xb53   :  { %1652 = vtanh.f32 %v536_v26 }
 0xb59   :  { %v1653_v28 = vpop.eup %1652 }
 0xb5a   :  { %539 = vrot.lane.b32.xlu1 %v1653_v28, %s1830_s0 }
 0xbcc   :  { %v540_v29 = vpop.permute.xlu1 %539 }
 0xbcd   :  { %v2033_v30 = vmul.f32 %v540_v29, %v522_v35 }
 0xbcf   :  { %547 = vrot.lane.b32.xlu0 %v2033_v30, %s1830_s0  ;;  %544 = vrot.lane.b32.xlu2 %v2033_v30, %s1831_s1 }
 0xc29   :  { %v2039_v31 = vpop.permute.xlu2 %544 }
 0xc41   :  { %v548_v32 = vpop.permute.xlu0 %547 }
 0xc42   :  { %v550_v34 = vsel %vm86_vm11, %v2039_v31, %v548_v32 }
 0xc43   :  { %v551_v36 = vmul.f32 %v550_v34, %v1968_v18 }
 0xc45   :  { %1574 = vmatmul.msk.f32.vlgmr.msrb.gmra.mxu2 %vm263_vm12, %v551_v36 }
 0xcc8   :  { %v572_v37 = vpop.f32.mrf.mxu2 }
 0xcc9   :  { %v575_v38 = vadd.f32 %v572_v37, %v1946_v43 }
 0xccb   :  { %v576_v39 = vmul.f32 %v575_v38, %v1929_v27 }
 0xccd   :  { %v1575_v40 = vmul.f32 -1.442695, %v576_v39 }
 0xccf   :  { %1654 = vpow2.f32 %v1575_v40 }
 0xcd5   :  { %v1655_v42 = vpop.eup %1654 }
 0xcd6   :  { %v580_v46 = vadd.f32 1.0, %v1655_v42 }
 0xcd8   :  { %1656 = vrcp.f32 %v580_v46  ;;  %v592_v49 = vand.u32 2147483648, %v580_v46  ;;  %v590_v51 = vand.u32 2147483647, %v580_v46  ;;  %vm586_vm3 = vweird.f32 %v580_v46 }
 0xcda   :  { %v593_v53 = vor.u32 1.1754944e-38, %v592_v49  ;;  %vm591_vm6 = vcmp.eq.f32.partialorder %v590_v51, 8.507059e+37 }
 0xcde   :  { %v1657_v47 = vpop.eup %1656 }
 0xcdf   :  { %v582_v48 = vmul.f32 %v1657_v47, %v580_v46  ;;  %vm587_vm2 = vweird.f32 %v1657_v47 }
 0xce0   :  { %vm588_vm4 = vmor %vm586_vm3, %vm587_vm2  ;;  %vm823_vm2 = vcmask 1045504  }
 0xce1   :  { %v583_v41 = vsub.f32 1.0, %v582_v48 }
 0xce3   :  { %v584_v50 = vmul.f32 %v1657_v47, %v583_v41 }
 0xce5   :  { %v585_v52 = vadd.f32 %v1657_v47, %v584_v50 }
 0xce7   :  { %v589_v56 = vsel %vm588_vm4, %v1657_v47, %v585_v52 }
 0xce8   :  { %v594_v43 = vsel %vm591_vm6, %v593_v53, %v589_v56 }
 0xce9   :  { %v596_v57 = vmul.f32 2.0, %v594_v43  ;;  %v598_v63 = vmul.f32 %v594_v43, %v536_v26 }
 0xceb   :  { %v1576_v58 = vadd.f32 -1.0, %v596_v57 }
 0xced   :  { %600 = vrot.lane.b32.xlu1 %v1576_v58, %s1830_s0 }
 0xd5f   :  { %v601_v59 = vpop.permute.xlu1 %600 }
 0xd60   :  { %v603_v61 = vmul.f32 %v601_v59, %v594_v43 }
 0xd62   :  { %605 = vrot.lane.b32.xlu2 %v603_v61, %s1831_s1 }
 0xdbc   :  { %v606_v0 = vpop.permute.xlu2 %605 }
 0xdbd   :  { %v608_v1 = vadd.f32 %v606_v0, %v598_v63 }
 0xdbf   :  { %1658 = vtanh.f32 %v608_v1 }
 0xdc5   :  { %v1659_v2 = vpop.eup %1658 }
 0xdc6   :  { %611 = vrot.lane.b32.xlu0 %v1659_v2, %s1830_s0 }
 0xe38   :  { %v612_v3 = vpop.permute.xlu0 %611 }
 0xe39   :  { %v2050_v5 = vmul.f32 %v612_v3, %v594_v43 }
 0xe3b   :  { %619 = vrot.lane.b32.xlu2 %v2050_v5, %s1830_s0  ;;  %616 = vrot.lane.b32.xlu1 %v2050_v5, %s1831_s1 }
 0xe95   :  { %v620_v6 = vpop.permute.xlu2 %619 }
 0xead   :  { %v2056_v7 = vpop.permute.xlu1 %616 }
 0xeae   :  { %v622_v8 = vsel %vm86_vm11, %v2056_v7, %v620_v6 }
 0xeaf   :  { %v623_v9 = vmul.f32 %v622_v8, %v1968_v18 }
 0xeb1   :  { %1577 = vmatmul.msk.f32.vlgmr.msrb.gmra.mxu3 %vm263_vm12, %v623_v9  ;;  %v775_v9 = vrot.slane %v2033_v30, 2 }
 0xf34   :  { %v644_v10 = vpop.f32.mrf.mxu3 }
 0xf35   :  { %v647_v33 = vadd.f32 %v644_v10, %v1949_v44  ;;  %v780_v10 = vrot.slane %v2016_v60, 2  ;;  %v790_v60 = vrot.slane %v1982_v54, 2 }
 0xf37   :  { %v648_v12 = vmul.f32 %v647_v33, %v1929_v27 }
 0xf39   :  { %v1578_v13 = vmul.f32 -1.442695, %v648_v12 }
 0xf3b   :  { %1660 = vpow2.f32 %v1578_v13  ;;  %v770_v13 = vrot.slane %v2050_v5, 2  ;;  %v840_v5 = vld [vmem:[#allocation5 + $0x60] sm:$0xff] }
 0xf41   :  { %v1661_v14 = vpop.eup %1660 }
 0xf42   :  { %v652_v15 = vadd.f32 1.0, %v1661_v14  ;;  %v785_v14 = vrot.slane %v1999_v22, 2  ;;  %v838_v22 = vld [vmem:[#allocation5 + $0x50] sm:$0xff] }
 0xf44   :  { %1662 = vrcp.f32 %v652_v15  ;;  %v664_v19 = vand.u32 2147483648, %v652_v15  ;;  %v662_v21 = vand.u32 2147483647, %v652_v15  ;;  %vm658_vm8 = vweird.f32 %v652_v15 }
 0xf46   :  { %v665_v25 = vor.u32 1.1754944e-38, %v664_v19  ;;  %vm663_vm10 = vcmp.eq.f32.partialorder %v662_v21, 8.507059e+37  ;;  %v843_v19 = vld [vmem:[#allocation5 + $0x78] sm:$0xff] }
 0xf47   :  { %895 = vmatpush.msra.mxu2 %v843_v19  ;;  %v839_v21 = vld [vmem:[#allocation5 + $0x58] sm:$0xff] }
 0xf4a   :  { %v1663_v16 = vpop.eup %1662 }
 0xf4b   :  { %v654_v35 = vmul.f32 %v1663_v16, %v652_v15  ;;  %vm659_vm7 = vweird.f32 %v1663_v16 }
 0xf4c   :  { %vm660_vm9 = vmor %vm658_vm8, %vm659_vm7 }
 0xf4d   :  { %v655_v17 = vsub.f32 1.0, %v654_v35 }
 0xf4f   :  { %v656_v11 = vmul.f32 %v1663_v16, %v655_v17  ;;  %v842_v17 = vld [vmem:[#allocation5 + $0x70] sm:$0xff] }
 0xf50   :  { %872 = vmatpush.msra.mxu1 %v842_v17 }
 0xf51   :  { %v657_v23 = vadd.f32 %v1663_v16, %v656_v11  ;;  %v841_v11 = vld [vmem:[#allocation5 + $0x68] sm:$0xff] }
 0xf52   :  { %873 = vmatpush.msra.mxu1 %v840_v5  ;;  %896 = vmatpush.msra.mxu2 %v841_v11 }
 0xf53   :  { %v661_v26 = vsel %vm660_vm9, %v1663_v16, %v657_v23  ;;  %v836_v23 = vld [vmem:[#allocation5 + $0x40] sm:$0xff] }
 0xf54   :  { %v666_v44 = vsel %vm663_vm10, %v665_v25, %v661_v26  ;;  %v837_v25 = vld [vmem:[#allocation5 + $0x48] sm:$0xff]  ;;  %874 = vmatpush.msra.mxu1 %v838_v22  ;;  %897 = vmatpush.msra.mxu2 %v839_v21  ;;  %v834_v26 = vld [vmem:[#allocation5 + $0x30] sm:$0xff] }
 0xf55   :  { %v668_v28 = vmul.f32 2.0, %v666_v44  ;;  %v670_v36 = vmul.f32 %v666_v44, %v608_v1 }
 0xf56   :  { %875 = vmatpush.msra.mxu1 %v836_v23  ;;  %898 = vmatpush.msra.mxu2 %v837_v25 }
 0xf57   :  { %v1579_v29 = vadd.f32 -1.0, %v668_v28 }
 0xf58   :  { %876 = vmatpush.msra.mxu1 %v834_v26 }
 0xf59   :  { %672 = vrot.lane.b32.xlu0 %v1579_v29, %s1830_s0 }
 0xfcb   :  { %v673_v32 = vpop.permute.xlu0 %672 }
 0xfcc   :  { %v675_v34 = vmul.f32 %v673_v32, %v666_v44  ;;  %v798_v32 = vrot.slane %v1960_v4, 2 }
 0xfce   :  { %677 = vrot.lane.b32.xlu1 %v675_v34, %s1831_s1  ;;  %v832_v34 = vld [vmem:[#allocation5 + $0x20] sm:$0xff] }
 0xfcf   :  { %877 = vmatpush.msra.mxu1 %v832_v34 }
0x1040   :  { %v678_v37 = vpop.permute.xlu1 %677 }
0x1041   :  { %v680_v38 = vadd.f32 %v678_v37, %v670_v36  ;;  %v833_v36 = vld [vmem:[#allocation5 + $0x28] sm:$0xff]  ;;  %v830_v37 = vld [vmem:[#allocation5 + $0x10] sm:$0xff] }
0x1042   :  { %878 = vmatpush.msra.mxu1 %v830_v37 }
0x1043   :  { %1664 = vtanh.f32 %v680_v38 }
0x1049   :  { %v1665_v39 = vpop.eup %1664 }
0x104a   :  { %683 = vrot.lane.b32.xlu2 %v1665_v39, %s1830_s0  ;;  %v828_v39 = vld [vmem:[#allocation5] sm:$0xff] }
0x104b   :  { %879 = vmatpush.msra.mxu1 %v828_v39 }
0x10a4   :  { %v684_v40 = vpop.permute.xlu2 %683 }
0x10a5   :  { %v686_v42 = vmul.f32 %v684_v40, %v666_v44  ;;  %v835_v44 = vld [vmem:[#allocation5 + $0x38] sm:$0xff]  ;;  %v829_v40 = vld [vmem:[#allocation5 + $0x8] sm:$0xff] }
0x10a6   :  { %899 = vmatpush.msra.mxu2 %v835_v44 }
0x10a7   :  { %691 = vrot.lane.b32.xlu1 %v686_v42, %s1830_s0  ;;  %688 = vrot.lane.b32.xlu0 %v686_v42, %s1831_s1  ;;  %v765_v8 = vrot.slane %v686_v42, 2 }
0x10a8   :  { %900 = vmatpush.msra.mxu2 %v833_v36 }
0x1119   :  { %v692_v46 = vpop.permute.xlu1 %691  ;;  %v2069_v47 = vpop.permute.xlu0 %688 }
0x111a   :  { %v694_v48 = vsel %vm86_vm11, %v2069_v47, %v692_v46 }
0x111b   :  { %v695_v41 = vmul.f32 %v694_v48, %v1968_v18 }
0x111d   :  { %1580 = vmatmul.msk.f32.vlgmr.msra.gmra.mxu0 %vm263_vm12, %v695_v41 }
0x119a   :  { %v716_v49 = vpop.f32.mrf.mxu0 }
0x119b   :  { %v719_v50 = vadd.f32 %v716_v49, %v1952_v45 }
0x119d   :  { %v720_v51 = vmul.f32 %v719_v50, %v1929_v27 }
0x119f   :  { %v1581_v52 = vmul.f32 -1.442695, %v720_v51 }
0x11a1   :  { %1666 = vpow2.f32 %v1581_v52 }
0x11a7   :  { %v1667_v53 = vpop.eup %1666 }
0x11a8   :  { %v724_v56 = vadd.f32 1.0, %v1667_v53 }
0x11aa   :  { %1668 = vrcp.f32 %v724_v56  ;;  %v736_v59 = vand.u32 2147483648, %v724_v56  ;;  %v734_v63 = vand.u32 2147483647, %v724_v56  ;;  %vm730_vm14 = vweird.f32 %v724_v56 }
0x11ac   :  { %v737_v1 = vor.u32 1.1754944e-38, %v736_v59  ;;  %vm735_vm1 = vcmp.eq.f32.partialorder %v734_v63, 8.507059e+37 }
0x11b0   :  { %v1669_v43 = vpop.eup %1668 }
0x11b1   :  { %v726_v57 = vmul.f32 %v1669_v43, %v724_v56  ;;  %vm731_vm13 = vweird.f32 %v1669_v43 }
0x11b2   :  { %vm732_vm15 = vmor %vm730_vm14, %vm731_vm13 }
0x11b3   :  { %v727_v58 = vsub.f32 1.0, %v726_v57 }
0x11b5   :  { %v728_v61 = vmul.f32 %v1669_v43, %v727_v58 }
0x11b7   :  { %v729_v0 = vadd.f32 %v1669_v43, %v728_v61 }
0x11b9   :  { %v733_v2 = vsel %vm732_vm15, %v1669_v43, %v729_v0 }
0x11ba   :  { %v738_v45 = vsel %vm735_vm1, %v737_v1, %v733_v2 }
0x11bb   :  { %v740_v3 = vmul.f32 2.0, %v738_v45  ;;  %v742_v15 = vmul.f32 %v738_v45, %v680_v38  ;;  %v831_v38 = vld [vmem:[#allocation5 + $0x18] sm:$0xff] }
0x11bc   :  { %901 = vmatpush.msra.mxu2 %v831_v38 }
0x11bd   :  { %v1582_v6 = vadd.f32 -1.0, %v740_v3 }
0x11be   :  { %902 = vmatpush.msra.mxu2 %v829_v40 }
0x11bf   :  { %744 = vrot.lane.b32.xlu2 %v1582_v6, %s1830_s0 }
0x11c7   :  { %766 = vrot.lane.b32.xlu2 %v765_v8, %s1830_s0 }
0x11cf   :  { %776 = vrot.lane.b32.xlu2 %v775_v9, %s1830_s0  ;;  %v852_v9 = vld [vmem:[%s2268_s6] sm:$0x3] }
0x11d7   :  { %781 = vrot.lane.b32.xlu2 %v780_v10, %s1830_s0  ;;  %v855_v10 = vperm.slane %v852_v9, 1 }
0x1219   :  { %v745_v33 = vpop.permute.xlu2 %744 }
0x121a   :  { %v747_v12 = vmul.f32 %v745_v33, %v738_v45 }
0x121c   :  { %749 = vrot.lane.b32.xlu0 %v747_v12, %s1831_s1 }
0x1221   :  { %v767_v42 = vpop.permute.xlu2 %766 }
0x1222   :  { %v769_v4 = vsel %vm86_vm11, %v1988_v55, %v767_v42 }
0x1223   :  { %v804_v51 = vrot.slane %v769_v4, 6 }
0x1224   :  { %771 = vrot.lane.b32.xlu0 %v770_v13, %s1830_s0 }
0x1229   :  { %v777_v41 = vpop.permute.xlu2 %776 }
0x122a   :  { %v779_v50 = vsel %vm86_vm11, %v2022_v62, %v777_v41 }
0x122b   :  { %v810_v57 = vrot.slane %v779_v50, 2 }
0x122c   :  { %786 = vrot.lane.b32.xlu0 %v785_v14, %s1830_s0 }
0x1231   :  { %v782_v61 = vpop.permute.xlu2 %781 }
0x1232   :  { %v784_v2 = vsel %vm86_vm11, %v2039_v31, %v782_v61  ;;  %v854_v31 = vperm.slane %v852_v9, 0 }
0x128e   :  { %v750_v30 = vpop.permute.xlu0 %749 }
0x128f   :  { %v752_v16 = vadd.f32 %v750_v30, %v742_v15 }
0x1291   :  { %1670 = vtanh.f32 %v752_v16 }
0x1296   :  { %v772_v46 = vpop.permute.xlu0 %771 }
0x1297   :  { %v1671_v35 = vpop.eup %1670  ;;  %v774_v49 = vsel %vm86_vm11, %v2005_v24, %v772_v46 }
0x1298   :  { %755 = vrot.lane.b32.xlu1 %v1671_v35, %s1830_s0  ;;  %v807_v56 = vrot.slane %v774_v49, 4 }
0x129e   :  { %v787_v52 = vpop.permute.xlu0 %786 }
0x129f   :  { %v789_v55 = vsel %vm86_vm11, %v2056_v7, %v787_v52 }
0x12a0   :  { %791 = vrot.lane.b32.xlu1 %v790_v60, %s1830_s0 }
0x130a   :  { %v756_v54 = vpop.permute.xlu1 %755 }
0x130b   :  { %v758_v28 = vmul.f32 %v756_v54, %v738_v45 }
0x130d   :  { %v760_v29 = vrot.slane %v758_v28, 2  ;;  %795 = vrot.lane.b32.xlu0 %v758_v28, %s1831_s1 }
0x130f   :  { %761 = vrot.lane.b32.xlu1 %v760_v29, %s1830_s0 }
0x1312   :  { %v792_v48 = vpop.permute.xlu1 %791 }
0x1313   :  { %v794_v24 = vsel %vm86_vm11, %v2069_v47, %v792_v48 }
0x1314   :  { %v816_v63 = vrot.slane %v794_v24, 4 }
0x1317   :  { %799 = vrot.lane.b32.xlu1 %v798_v32, %s1830_s0 }
0x137f   :  { %v796_v0 = vpop.permute.xlu0 %795 }
0x1381   :  { %v762_v53 = vpop.permute.xlu1 %761 }
0x1382   :  { %v764_v43 = vsel %vm86_vm11, %v1970_v20, %v762_v53  ;;  %v813_v20 = vrot.slane %v789_v55, 6 }
0x1383   :  { %v821_v58 = vsel %vm181_vm5, %v764_v43, %v804_v51 }
0x1384   :  { %v822_v59 = vsel %vm125_vm0, %v821_v58, %v807_v56  ;;  %v825_v3 = vsel %vm181_vm5, %v784_v2, %v813_v20  ;;  %v850_v2 = vld [vmem:[#allocation7 + $0x30] sm:$0xff] }
0x1385   :  { %v824_v62 = vsel %vm823_vm2, %v822_v59, %v810_v57  ;;  %v826_v47 = vsel %vm125_vm0, %v825_v3, %v816_v63  ;;  %v847_v3 = vld [vmem:[#allocation7 + $0x18] sm:$0xff] }
0x1386   :  { %1583 = vmatmul.msk.f32.vlgmr.msra.gmra.mxu1 %vm263_vm12, %v824_v62  ;;  %1585 = vmatmul.msk.f32.vlgmr.msra.gmra.mxu2 %vm263_vm12, %v824_v62 }
0x1389   :  { %v800_v1 = vpop.permute.xlu1 %799 }
0x138a   :  { %v802_v7 = vsel %vm86_vm11, %v796_v0, %v800_v1  ;;  %v851_v1 = vld [vmem:[#allocation7 + $0x38] sm:$0xff] }
0x138b   :  { %v819_v45 = vrot.slane %v802_v7, 2  ;;  %1005 = vmatpush.msra.mxu3 %v851_v1  ;;  %1077 = vmatpush.msrb.mxu0 %v851_v1  ;;  %v849_v7 = vld [vmem:[#allocation7 + $0x28] sm:$0xff] }
0x138c   :  { %1149 = vmatpush.msrb.mxu1 %v851_v1  ;;  %1221 = vmatpush.msrb.mxu2 %v851_v1 }
0x138d   :  { %v827_v6 = vsel %vm823_vm2, %v826_v47, %v819_v45  ;;  %1006 = vmatpush.msra.mxu3 %v850_v2  ;;  %1078 = vmatpush.msrb.mxu0 %v850_v2  ;;  %v848_v45 = vld [vmem:[#allocation7 + $0x20] sm:$0xff]  ;;  %v846_v47 = vld [vmem:[#allocation7 + $0x10] sm:$0xff] }
0x138e   :  { %1584 = vmatmul.msk.f32.gmra.mxu1 %vm263_vm12, %v827_v6  ;;  %1586 = vmatmul.msk.f32.gmra.mxu2 %vm263_vm12, %v827_v6  ;;  %v845_v6 = vld [vmem:[#allocation7 + $0x8] sm:$0xff] }
0x138f   :  { %1150 = vmatpush.msrb.mxu1 %v850_v2  ;;  %1222 = vmatpush.msrb.mxu2 %v850_v2 }
0x1390   :  { %1007 = vmatpush.msra.mxu3 %v849_v7  ;;  %1079 = vmatpush.msrb.mxu0 %v849_v7 }
0x1391   :  { %1151 = vmatpush.msrb.mxu1 %v849_v7  ;;  %1223 = vmatpush.msrb.mxu2 %v849_v7 }
0x1392   :  { %1008 = vmatpush.msra.mxu3 %v848_v45  ;;  %1080 = vmatpush.msrb.mxu0 %v848_v45 }
0x1393   :  { %1152 = vmatpush.msrb.mxu1 %v848_v45  ;;  %1224 = vmatpush.msrb.mxu2 %v848_v45 }
0x1394   :  { %1009 = vmatpush.msra.mxu3 %v847_v3  ;;  %1081 = vmatpush.msrb.mxu0 %v847_v3 }
0x1395   :  { %1153 = vmatpush.msrb.mxu1 %v847_v3  ;;  %1225 = vmatpush.msrb.mxu2 %v847_v3 }
0x1396   :  { %1010 = vmatpush.msra.mxu3 %v846_v47  ;;  %1082 = vmatpush.msrb.mxu0 %v846_v47 }
0x1397   :  { %1154 = vmatpush.msrb.mxu1 %v846_v47  ;;  %1226 = vmatpush.msrb.mxu2 %v846_v47 }
0x1398   :  { %1011 = vmatpush.msra.mxu3 %v845_v6  ;;  %1083 = vmatpush.msrb.mxu0 %v845_v6 }
0x1399   :  { %1155 = vmatpush.msrb.mxu1 %v845_v6  ;;  %1227 = vmatpush.msrb.mxu2 %v845_v6 }
0x1403   :  { %v881_v8 = vpop.f32.mrf.mxu1 }
0x1404   :  { %v882_v30 = vadd.f32 %v881_v8, %v854_v31  ;;  %v844_v8 = vld [vmem:[#allocation7] sm:$0xff] }
0x1405   :  { %1012 = vmatpush.msra.mxu3 %v844_v8  ;;  %1084 = vmatpush.msrb.mxu0 %v844_v8 }
0x1406   :  { %v920_v26 = vrot.slane %v882_v30, 4  ;;  %v915_v44 = vrot.slane %v882_v30, 2  ;;  %v923_v54 = vrot.slane %v882_v30, 6  ;;  %1156 = vmatpush.msrb.mxu1 %v844_v8  ;;  %1228 = vmatpush.msrb.mxu2 %v844_v8 }
0x1407   :  { %1293 = vmatpush.msrb.mxu3 %v851_v1  ;;  %1365 = vmatpush.msra.mxu0 %v851_v1 }
0x1408   :  { %1437 = vmatpush.msra.mxu1 %v851_v1 }
0x1409   :  { %v904_v33 = vpop.f32.mrf.mxu2  ;;  %1294 = vmatpush.msrb.mxu3 %v850_v2  ;;  %1366 = vmatpush.msra.mxu0 %v850_v2 }
0x140a   :  { %v905_v12 = vadd.f32 %v904_v33, %v855_v10  ;;  %1438 = vmatpush.msra.mxu1 %v850_v2 }
0x140b   :  { %v884_v13 = vpop.f32.mrf.mxu1  ;;  %1295 = vmatpush.msrb.mxu3 %v849_v7  ;;  %1367 = vmatpush.msra.mxu0 %v849_v7 }
0x140c   :  { %v885_v14 = vadd.f32 %v884_v13, %v854_v31  ;;  %v929_v15 = vrot.slane %v905_v12, 4  ;;  %v935_v16 = vrot.slane %v905_v12, 2  ;;  %v943_v35 = vrot.slane %v905_v12, 6  ;;  %1439 = vmatpush.msra.mxu1 %v849_v7 }
0x140d   :  { %1296 = vmatpush.msrb.mxu3 %v848_v45  ;;  %1368 = vmatpush.msra.mxu0 %v848_v45 }
0x140e   :  { %v2124_v60 = vsel %vm181_vm5, %v885_v14, %v929_v15  ;;  %v933_v17 = vrot.slane %v885_v14, 2  ;;  %v938_v19 = vrot.slane %v885_v14, 4  ;;  %v941_v5 = vrot.slane %v885_v14, 6  ;;  %1440 = vmatpush.msra.mxu1 %v848_v45 }
0x140f   :  { %1297 = vmatpush.msrb.mxu3 %v847_v3  ;;  %1369 = vmatpush.msra.mxu0 %v847_v3 }
0x1410   :  { %v2127_v11 = vsel %vm181_vm5, %v933_v17, %v935_v16  ;;  %v2130_v22 = vsel %vm181_vm5, %v938_v19, %v905_v12  ;;  %v2133_v21 = vsel %vm181_vm5, %v941_v5, %v943_v35  ;;  %1441 = vmatpush.msra.mxu1 %v847_v3 }
0x1411   :  { %v907_v23 = vpop.f32.mrf.mxu2  ;;  %1298 = vmatpush.msrb.mxu3 %v846_v47  ;;  %1370 = vmatpush.msra.mxu0 %v846_v47 }
0x1412   :  { %v908_v25 = vadd.f32 %v907_v23, %v855_v10  ;;  %1442 = vmatpush.msra.mxu1 %v846_v47 }
0x1413   :  { %1299 = vmatpush.msrb.mxu3 %v845_v6  ;;  %1371 = vmatpush.msra.mxu0 %v845_v6 }
0x1414   :  { %v911_v28 = vrot.slane %v908_v25, 4  ;;  %v917_v29 = vrot.slane %v908_v25, 2  ;;  %v2136_v32 = vsel %vm181_vm5, %v920_v26, %v908_v25  ;;  %v925_v34 = vrot.slane %v908_v25, 6  ;;  %1443 = vmatpush.msra.mxu1 %v845_v6 }
0x1415   :  { %1300 = vmatpush.msrb.mxu3 %v844_v8  ;;  %1372 = vmatpush.msra.mxu0 %v844_v8 }
0x1416   :  { %v913_v36 = vsel %vm181_vm5, %v882_v30, %v911_v28  ;;  %v2140_v37 = vsel %vm181_vm5, %v915_v44, %v917_v29  ;;  %v2143_v38 = vsel %vm181_vm5, %v923_v54, %v925_v34  ;;  %1444 = vmatpush.msra.mxu1 %v844_v8 }
0x1417   :  { %v946_v39 = vmul.f32 %v913_v36, %v1929_v27 }
0x1419   :  { %v1587_v40 = vmul.f32 -1.442695, %v946_v39 }
0x141b   :  { %1672 = vpow2.f32 %v1587_v40 }
0x1421   :  { %v1673_v42 = vpop.eup %1672 }
0x1422   :  { %v950_v46 = vadd.f32 1.0, %v1673_v42 }
0x1424   :  { %1674 = vrcp.f32 %v950_v46  ;;  %v962_v49 = vand.u32 2147483648, %v950_v46  ;;  %v960_v51 = vand.u32 2147483647, %v950_v46  ;;  %vm956_vm3 = vweird.f32 %v950_v46 }
0x1426   :  { %v963_v53 = vor.u32 1.1754944e-38, %v962_v49  ;;  %vm961_vm5 = vcmp.eq.f32.partialorder %v960_v51, 8.507059e+37 }
0x142a   :  { %v1675_v48 = vpop.eup %1674 }
0x142b   :  { %v952_v41 = vmul.f32 %v1675_v48, %v950_v46  ;;  %vm957_vm0 = vweird.f32 %v1675_v48 }
0x142c   :  { %vm958_vm4 = vmor %vm956_vm3, %vm957_vm0 }
0x142d   :  { %v953_v4 = vsub.f32 1.0, %v952_v41 }
0x142f   :  { %v954_v50 = vmul.f32 %v1675_v48, %v953_v4 }
0x1431   :  { %v955_v52 = vadd.f32 %v1675_v48, %v954_v50 }
0x1433   :  { %v959_v56 = vsel %vm958_vm4, %v1675_v48, %v955_v52 }
0x1434   :  { %v964_v43 = vsel %vm961_vm5, %v963_v53, %v959_v56 }
0x1435   :  { %v966_v57 = vmul.f32 2.0, %v964_v43  ;;  %v968_v24 = vmul.f32 0.0, %v964_v43 }
0x1437   :  { %v1588_v58 = vadd.f32 -1.0, %v966_v57 }
0x1439   :  { %970 = vrot.lane.b32.xlu2 %v1588_v58, %s1830_s0 }
0x1493   :  { %v971_v55 = vpop.permute.xlu2 %970 }
0x1494   :  { %v973_v59 = vmul.f32 %v971_v55, %v964_v43 }
0x1496   :  { %975 = vrot.lane.b32.xlu0 %v973_v59, %s1831_s1 }
0x1508   :  { %v976_v62 = vpop.permute.xlu0 %975 }
0x1509   :  { %v2148_v61 = vadd.f32 %v976_v62, %v968_v24 }
0x150b   :  { %1676 = vtanh.f32 %v2148_v61 }
0x1511   :  { %v1677_v20 = vpop.eup %1676 }
0x1512   :  { %981 = vrot.lane.b32.xlu1 %v1677_v20, %s1830_s0 }
0x1584   :  { %v982_v63 = vpop.permute.xlu1 %981 }
0x1585   :  { %v2152_v0 = vmul.f32 %v982_v63, %v964_v43 }
0x1587   :  { %989 = vrot.lane.b32.xlu0 %v2152_v0, %s1830_s0  ;;  %986 = vrot.lane.b32.xlu2 %v2152_v0, %s1831_s1 }
0x15e1   :  { %v987_v9 = vpop.permute.xlu2 %986 }
0x15f9   :  { %v990_v10 = vpop.permute.xlu0 %989 }
0x15fa   :  { %v992_v31 = vsel %vm86_vm11, %v987_v9, %v990_v10 }
0x15fb   :  { %v993_v33 = vmul.f32 %v992_v31, %v1968_v18 }
0x15fd   :  { %1589 = vmatmul.msk.f32.vlgmr.msra.gmra.mxu3 %vm263_vm12, %v993_v33 }
0x1680   :  { %v1014_v12 = vpop.f32.mrf.mxu3 }
0x1681   :  { %v1017_v13 = vadd.f32 %v1014_v12, %v2140_v37 }
0x1683   :  { %v1018_v14 = vmul.f32 %v1017_v13, %v1929_v27 }
0x1685   :  { %v1590_v15 = vmul.f32 -1.442695, %v1018_v14 }
0x1687   :  { %1678 = vpow2.f32 %v1590_v15 }
0x168d   :  { %v1679_v30 = vpop.eup %1678 }
0x168e   :  { %v1022_v16 = vadd.f32 1.0, %v1679_v30 }
0x1690   :  { %1680 = vrcp.f32 %v1022_v16  ;;  %v1034_v5 = vand.u32 2147483648, %v1022_v16  ;;  %v1032_v25 = vand.u32 2147483647, %v1022_v16  ;;  %vm1028_vm7 = vweird.f32 %v1022_v16 }
0x1692   :  { %v1035_v44 = vor.u32 1.1754944e-38, %v1034_v5  ;;  %vm1033_vm9 = vcmp.eq.f32.partialorder %v1032_v25, 8.507059e+37 }
0x1696   :  { %v1681_v35 = vpop.eup %1680 }
0x1697   :  { %v1024_v17 = vmul.f32 %v1681_v35, %v1022_v16  ;;  %vm1029_vm6 = vweird.f32 %v1681_v35 }
0x1698   :  { %vm1030_vm8 = vmor %vm1028_vm7, %vm1029_vm6 }
0x1699   :  { %v1025_v19 = vsub.f32 1.0, %v1024_v17 }
0x169b   :  { %v1026_v23 = vmul.f32 %v1681_v35, %v1025_v19 }
0x169d   :  { %v1027_v26 = vadd.f32 %v1681_v35, %v1026_v23 }
0x169f   :  { %v1031_v54 = vsel %vm1030_vm8, %v1681_v35, %v1027_v26 }
0x16a0   :  { %v1036_v28 = vsel %vm1033_vm9, %v1035_v44, %v1031_v54 }
0x16a1   :  { %v1038_v29 = vmul.f32 2.0, %v1036_v28  ;;  %v1040_v39 = vmul.f32 %v1036_v28, %v2148_v61 }
0x16a3   :  { %v1591_v34 = vadd.f32 -1.0, %v1038_v29 }
0x16a5   :  { %1042 = vrot.lane.b32.xlu1 %v1591_v34, %s1830_s0 }
0x1717   :  { %v1043_v36 = vpop.permute.xlu1 %1042 }
0x1718   :  { %v1045_v37 = vmul.f32 %v1043_v36, %v1036_v28 }
0x171a   :  { %1047 = vrot.lane.b32.xlu2 %v1045_v37, %s1831_s1 }
0x1774   :  { %v1048_v40 = vpop.permute.xlu2 %1047 }
0x1775   :  { %v1050_v42 = vadd.f32 %v1048_v40, %v1040_v39 }
0x1777   :  { %1682 = vtanh.f32 %v1050_v42 }
0x177d   :  { %v1683_v46 = vpop.eup %1682 }
0x177e   :  { %1053 = vrot.lane.b32.xlu0 %v1683_v46, %s1830_s0 }
0x17f0   :  { %v1054_v48 = vpop.permute.xlu0 %1053 }
0x17f1   :  { %v1056_v41 = vmul.f32 %v1054_v48, %v1036_v28 }
0x17f3   :  { %1061 = vrot.lane.b32.xlu2 %v1056_v41, %s1830_s0  ;;  %1058 = vrot.lane.b32.xlu1 %v1056_v41, %s1831_s1 }
0x184d   :  { %v1062_v4 = vpop.permute.xlu2 %1061 }
0x1865   :  { %v1059_v49 = vpop.permute.xlu1 %1058 }
0x1866   :  { %v1064_v50 = vsel %vm86_vm11, %v1059_v49, %v1062_v4 }
0x1867   :  { %v1065_v51 = vmul.f32 %v1064_v50, %v1968_v18 }
0x1869   :  { %1592 = vmatmul.msk.f32.vlgmr.msrb.gmra.mxu0 %vm263_vm12, %v1065_v51 }
0x18e6   :  { %v1086_v52 = vpop.f32.mrf.mxu0 }
0x18e7   :  { %v1089_v53 = vadd.f32 %v1086_v52, %v2136_v32 }
0x18e9   :  { %v1090_v56 = vmul.f32 %v1089_v53, %v1929_v27 }
0x18eb   :  { %v1593_v43 = vmul.f32 -1.442695, %v1090_v56 }
0x18ed   :  { %1684 = vpow2.f32 %v1593_v43 }
0x18f3   :  { %v1685_v57 = vpop.eup %1684 }
0x18f4   :  { %v1094_v58 = vadd.f32 1.0, %v1685_v57 }
0x18f6   :  { %1686 = vrcp.f32 %v1094_v58  ;;  %v1106_v62 = vand.u32 2147483648, %v1094_v58  ;;  %v1104_v20 = vand.u32 2147483647, %v1094_v58  ;;  %vm1100_vm13 = vweird.f32 %v1094_v58 }
0x18f8   :  { %v1107_v1 = vor.u32 1.1754944e-38, %v1106_v62  ;;  %vm1105_vm15 = vcmp.eq.f32.partialorder %v1104_v20, 8.507059e+37 }
0x18fc   :  { %v1687_v55 = vpop.eup %1686 }
0x18fd   :  { %v1096_v59 = vmul.f32 %v1687_v55, %v1094_v58  ;;  %vm1101_vm10 = vweird.f32 %v1687_v55 }
0x18fe   :  { %vm1102_vm14 = vmor %vm1100_vm13, %vm1101_vm10 }
0x18ff   :  { %v1097_v24 = vsub.f32 1.0, %v1096_v59 }
0x1901   :  { %v1098_v61 = vmul.f32 %v1687_v55, %v1097_v24 }
0x1903   :  { %v1099_v63 = vadd.f32 %v1687_v55, %v1098_v61 }
0x1905   :  { %v1103_v2 = vsel %vm1102_vm14, %v1687_v55, %v1099_v63 }
0x1906   :  { %v1108_v32 = vsel %vm1105_vm15, %v1107_v1, %v1103_v2 }
0x1907   :  { %v1110_v7 = vmul.f32 2.0, %v1108_v32  ;;  %v1112_v6 = vmul.f32 %v1108_v32, %v1050_v42 }
0x1909   :  { %v1594_v45 = vadd.f32 -1.0, %v1110_v7 }
0x190b   :  { %1114 = vrot.lane.b32.xlu0 %v1594_v45, %s1830_s0 }
0x197d   :  { %v1115_v3 = vpop.permute.xlu0 %1114 }
0x197e   :  { %v1117_v47 = vmul.f32 %v1115_v3, %v1108_v32 }
0x1980   :  { %1119 = vrot.lane.b32.xlu1 %v1117_v47, %s1831_s1 }
0x19f2   :  { %v1120_v8 = vpop.permute.xlu1 %1119 }
0x19f3   :  { %v1122_v9 = vadd.f32 %v1120_v8, %v1112_v6 }
0x19f5   :  { %1688 = vtanh.f32 %v1122_v9 }
0x19fb   :  { %v1689_v10 = vpop.eup %1688 }
0x19fc   :  { %1125 = vrot.lane.b32.xlu2 %v1689_v10, %s1830_s0 }
0x1a56   :  { %v1126_v31 = vpop.permute.xlu2 %1125 }
0x1a57   :  { %v1128_v33 = vmul.f32 %v1126_v31, %v1108_v32 }
0x1a59   :  { %1133 = vrot.lane.b32.xlu1 %v1128_v33, %s1830_s0  ;;  %1130 = vrot.lane.b32.xlu0 %v1128_v33, %s1831_s1 }
0x1acb   :  { %v1134_v12 = vpop.permute.xlu1 %1133  ;;  %v1131_v13 = vpop.permute.xlu0 %1130 }
0x1acc   :  { %v1136_v14 = vsel %vm86_vm11, %v1131_v13, %v1134_v12 }
0x1acd   :  { %v1137_v15 = vmul.f32 %v1136_v14, %v1968_v18 }
0x1acf   :  { %1595 = vmatmul.msk.f32.vlgmr.msrb.gmra.mxu1 %vm263_vm12, %v1137_v15 }
0x1b4c   :  { %v1158_v30 = vpop.f32.mrf.mxu1 }
0x1b4d   :  { %v1161_v16 = vadd.f32 %v1158_v30, %v2143_v38 }
0x1b4f   :  { %v1162_v35 = vmul.f32 %v1161_v16, %v1929_v27 }
0x1b51   :  { %v1596_v17 = vmul.f32 -1.442695, %v1162_v35 }
0x1b53   :  { %1690 = vpow2.f32 %v1596_v17 }
0x1b59   :  { %v1691_v19 = vpop.eup %1690 }
0x1b5a   :  { %v1166_v5 = vadd.f32 1.0, %v1691_v19 }
0x1b5c   :  { %1692 = vrcp.f32 %v1166_v5  ;;  %v1178_v44 = vand.u32 2147483648, %v1166_v5  ;;  %v1176_v28 = vand.u32 2147483647, %v1166_v5  ;;  %vm1172_vm2 = vweird.f32 %v1166_v5 }
0x1b5e   :  { %v1179_v34 = vor.u32 1.1754944e-38, %v1178_v44  ;;  %vm1177_vm3 = vcmp.eq.f32.partialorder %v1176_v28, 8.507059e+37 }
0x1b62   :  { %v1693_v23 = vpop.eup %1692 }
0x1b63   :  { %v1168_v25 = vmul.f32 %v1693_v23, %v1166_v5  ;;  %vm1173_vm1 = vweird.f32 %v1693_v23 }
0x1b64   :  { %vm1174_vm0 = vmor %vm1172_vm2, %vm1173_vm1 }
0x1b65   :  { %v1169_v26 = vsub.f32 1.0, %v1168_v25 }
0x1b67   :  { %v1170_v54 = vmul.f32 %v1693_v23, %v1169_v26 }
0x1b69   :  { %v1171_v29 = vadd.f32 %v1693_v23, %v1170_v54 }
0x1b6b   :  { %v1175_v36 = vsel %vm1174_vm0, %v1693_v23, %v1171_v29 }
0x1b6c   :  { %v1180_v38 = vsel %vm1177_vm3, %v1179_v34, %v1175_v36 }
0x1b6d   :  { %v1182_v37 = vmul.f32 2.0, %v1180_v38  ;;  %v1184_v46 = vmul.f32 %v1180_v38, %v1122_v9 }
0x1b6f   :  { %v1597_v39 = vadd.f32 -1.0, %v1182_v37 }
0x1b71   :  { %1186 = vrot.lane.b32.xlu2 %v1597_v39, %s1830_s0 }
0x1bcb   :  { %v1187_v40 = vpop.permute.xlu2 %1186 }
0x1bcc   :  { %v1189_v42 = vmul.f32 %v1187_v40, %v1180_v38 }
0x1bce   :  { %1191 = vrot.lane.b32.xlu0 %v1189_v42, %s1831_s1 }
0x1c40   :  { %v1192_v48 = vpop.permute.xlu0 %1191 }
0x1c41   :  { %v1194_v41 = vadd.f32 %v1192_v48, %v1184_v46 }
0x1c43   :  { %1694 = vtanh.f32 %v1194_v41 }
0x1c49   :  { %v1695_v4 = vpop.eup %1694 }
0x1c4a   :  { %1197 = vrot.lane.b32.xlu1 %v1695_v4, %s1830_s0 }
0x1cbc   :  { %v1198_v49 = vpop.permute.xlu1 %1197 }
0x1cbd   :  { %v1200_v50 = vmul.f32 %v1198_v49, %v1180_v38 }
0x1cbf   :  { %1205 = vrot.lane.b32.xlu0 %v1200_v50, %s1830_s0  ;;  %1202 = vrot.lane.b32.xlu2 %v1200_v50, %s1831_s1 }
0x1d19   :  { %v1203_v51 = vpop.permute.xlu2 %1202 }
0x1d31   :  { %v1206_v52 = vpop.permute.xlu0 %1205 }
0x1d32   :  { %v1208_v53 = vsel %vm86_vm11, %v1203_v51, %v1206_v52 }
0x1d33   :  { %v1209_v56 = vmul.f32 %v1208_v53, %v1968_v18 }
0x1d35   :  { %1598 = vmatmul.msk.f32.vlgmr.msrb.gmra.mxu2 %vm263_vm12, %v1209_v56 }
0x1db8   :  { %v1230_v43 = vpop.f32.mrf.mxu2 }
0x1db9   :  { %v1233_v57 = vadd.f32 %v1230_v43, %v2124_v60 }
0x1dbb   :  { %v1234_v58 = vmul.f32 %v1233_v57, %v1929_v27 }
0x1dbd   :  { %v1599_v55 = vmul.f32 -1.442695, %v1234_v58 }
0x1dbf   :  { %1696 = vpow2.f32 %v1599_v55 }
0x1dc5   :  { %v1697_v59 = vpop.eup %1696 }
0x1dc6   :  { %v1238_v24 = vadd.f32 1.0, %v1697_v59 }
0x1dc8   :  { %1698 = vrcp.f32 %v1238_v24  ;;  %v1250_v63 = vand.u32 2147483648, %v1238_v24  ;;  %v1248_v2 = vand.u32 2147483647, %v1238_v24  ;;  %vm1244_vm5 = vweird.f32 %v1238_v24 }
0x1dca   :  { %v1251_v7 = vor.u32 1.1754944e-38, %v1250_v63  ;;  %vm1249_vm7 = vcmp.eq.f32.partialorder %v1248_v2, 8.507059e+37 }
0x1dce   :  { %v1699_v62 = vpop.eup %1698 }
0x1dcf   :  { %v1240_v61 = vmul.f32 %v1699_v62, %v1238_v24  ;;  %vm1245_vm4 = vweird.f32 %v1699_v62 }
0x1dd0   :  { %vm1246_vm6 = vmor %vm1244_vm5, %vm1245_vm4 }
0x1dd1   :  { %v1241_v20 = vsub.f32 1.0, %v1240_v61 }
0x1dd3   :  { %v1242_v1 = vmul.f32 %v1699_v62, %v1241_v20 }
0x1dd5   :  { %v1243_v32 = vadd.f32 %v1699_v62, %v1242_v1 }
0x1dd7   :  { %v1247_v45 = vsel %vm1246_vm6, %v1699_v62, %v1243_v32  ;;  %vm1533_vm6 = vcmask 74752  }
0x1dd8   :  { %v1252_v60 = vsel %vm1249_vm7, %v1251_v7, %v1247_v45 }
0x1dd9   :  { %v1254_v3 = vmul.f32 2.0, %v1252_v60  ;;  %v1256_v9 = vmul.f32 %v1252_v60, %v1194_v41 }
0x1ddb   :  { %v1600_v47 = vadd.f32 -1.0, %v1254_v3 }
0x1ddd   :  { %1258 = vrot.lane.b32.xlu1 %v1600_v47, %s1830_s0 }
0x1e4f   :  { %v1259_v6 = vpop.permute.xlu1 %1258 }
0x1e50   :  { %v1261_v8 = vmul.f32 %v1259_v6, %v1252_v60 }
0x1e52   :  { %1263 = vrot.lane.b32.xlu2 %v1261_v8, %s1831_s1 }
0x1eac   :  { %v1264_v10 = vpop.permute.xlu2 %1263 }
0x1ead   :  { %v1266_v31 = vadd.f32 %v1264_v10, %v1256_v9 }
0x1eaf   :  { %1700 = vtanh.f32 %v1266_v31 }
0x1eb5   :  { %v1701_v33 = vpop.eup %1700 }
0x1eb6   :  { %1269 = vrot.lane.b32.xlu0 %v1701_v33, %s1830_s0 }
0x1f28   :  { %v1270_v12 = vpop.permute.xlu0 %1269 }
0x1f29   :  { %v1272_v13 = vmul.f32 %v1270_v12, %v1252_v60 }
0x1f2b   :  { %1277 = vrot.lane.b32.xlu2 %v1272_v13, %s1830_s0  ;;  %1274 = vrot.lane.b32.xlu1 %v1272_v13, %s1831_s1 }
0x1f85   :  { %v1278_v14 = vpop.permute.xlu2 %1277 }
0x1f9d   :  { %v1275_v15 = vpop.permute.xlu1 %1274 }
0x1f9e   :  { %v1280_v30 = vsel %vm86_vm11, %v1275_v15, %v1278_v14 }
0x1f9f   :  { %v1281_v16 = vmul.f32 %v1280_v30, %v1968_v18 }
0x1fa1   :  { %1601 = vmatmul.msk.f32.vlgmr.msrb.gmra.mxu3 %vm263_vm12, %v1281_v16 }
0x2024   :  { %v1302_v35 = vpop.f32.mrf.mxu3 }
0x2025   :  { %v1305_v17 = vadd.f32 %v1302_v35, %v2127_v11 }
0x2027   :  { %v1306_v19 = vmul.f32 %v1305_v17, %v1929_v27 }
0x2029   :  { %v1602_v5 = vmul.f32 -1.442695, %v1306_v19 }
0x202b   :  { %1702 = vpow2.f32 %v1602_v5 }
0x2031   :  { %v1703_v23 = vpop.eup %1702 }
0x2032   :  { %v1310_v25 = vadd.f32 1.0, %v1703_v23 }
0x2034   :  { %1704 = vrcp.f32 %v1310_v25  ;;  %v1322_v28 = vand.u32 2147483648, %v1310_v25  ;;  %v1320_v34 = vand.u32 2147483647, %v1310_v25  ;;  %vm1316_vm9 = vweird.f32 %v1310_v25 }
0x2036   :  { %v1323_v38 = vor.u32 1.1754944e-38, %v1322_v28  ;;  %vm1321_vm13 = vcmp.eq.f32.partialorder %v1320_v34, 8.507059e+37 }
0x203a   :  { %v1705_v26 = vpop.eup %1704 }
0x203b   :  { %v1312_v44 = vmul.f32 %v1705_v26, %v1310_v25  ;;  %vm1317_vm8 = vweird.f32 %v1705_v26 }
0x203c   :  { %vm1318_vm10 = vmor %vm1316_vm9, %vm1317_vm8 }
0x203d   :  { %v1313_v54 = vsub.f32 1.0, %v1312_v44 }
0x203f   :  { %v1314_v29 = vmul.f32 %v1705_v26, %v1313_v54 }
0x2041   :  { %v1315_v36 = vadd.f32 %v1705_v26, %v1314_v29 }
0x2043   :  { %v1319_v37 = vsel %vm1318_vm10, %v1705_v26, %v1315_v36 }
0x2044   :  { %v1324_v11 = vsel %vm1321_vm13, %v1323_v38, %v1319_v37 }
0x2045   :  { %v1326_v39 = vmul.f32 2.0, %v1324_v11  ;;  %v1328_v48 = vmul.f32 %v1324_v11, %v1266_v31 }
0x2047   :  { %v1603_v40 = vadd.f32 -1.0, %v1326_v39 }
0x2049   :  { %1330 = vrot.lane.b32.xlu0 %v1603_v40, %s1830_s0  ;;  %v1493_v40 = vrot.slane %v2152_v0, 2  ;;  %v1503_v0 = vld [vmem:[%s2269_s7 + $0x28] sm:$0xff] }
0x20bb   :  { %v1331_v42 = vpop.permute.xlu0 %1330 }
0x20bc   :  { %v1333_v46 = vmul.f32 %v1331_v42, %v1324_v11 }
0x20be   :  { %1335 = vrot.lane.b32.xlu1 %v1333_v46, %s1831_s1 }
0x2130   :  { %v1336_v41 = vpop.permute.xlu1 %1335 }
0x2131   :  { %v1338_v4 = vadd.f32 %v1336_v41, %v1328_v48 }
0x2133   :  { %1706 = vtanh.f32 %v1338_v4 }
0x2139   :  { %v1707_v49 = vpop.eup %1706 }
0x213a   :  { %1341 = vrot.lane.b32.xlu2 %v1707_v49, %s1830_s0  ;;  %v1504_v49 = vld [vmem:[%s2269_s7 + $0x30] sm:$0xff] }
0x2194   :  { %v1342_v50 = vpop.permute.xlu2 %1341 }
0x2195   :  { %v1344_v51 = vmul.f32 %v1342_v50, %v1324_v11  ;;  %v1502_v50 = vld [vmem:[%s2269_s7 + $0x20] sm:$0xff] }
0x2197   :  { %1349 = vrot.lane.b32.xlu1 %v1344_v51, %s1830_s0  ;;  %1346 = vrot.lane.b32.xlu0 %v1344_v51, %s1831_s1  ;;  %v1501_v51 = vld [vmem:[%s2269_s7 + $0x18] sm:$0xff] }
0x2209   :  { %v1350_v52 = vpop.permute.xlu1 %1349  ;;  %v1347_v53 = vpop.permute.xlu0 %1346 }
0x220a   :  { %v1352_v56 = vsel %vm86_vm11, %v1347_v53, %v1350_v52  ;;  %v1500_v52 = vld [vmem:[%s2269_s7 + $0x10] sm:$0xff]  ;;  %v1499_v53 = vld [vmem:[%s2269_s7 + $0x8] sm:$0xff] }
0x220b   :  { %v1353_v43 = vmul.f32 %v1352_v56, %v1968_v18 }
0x220d   :  { %1604 = vmatmul.msk.f32.vlgmr.msra.gmra.mxu0 %vm263_vm12, %v1353_v43 }
0x228a   :  { %v1374_v57 = vpop.f32.mrf.mxu0 }
0x228b   :  { %v1377_v58 = vadd.f32 %v1374_v57, %v2130_v22  ;;  %v1498_v57 = vld [vmem:[%s2269_s7] sm:$0xff] }
0x228d   :  { %v1378_v55 = vmul.f32 %v1377_v58, %v1929_v27 }
0x228f   :  { %v1605_v59 = vmul.f32 -1.442695, %v1378_v55 }
0x2291   :  { %1708 = vpow2.f32 %v1605_v59 }
0x2297   :  { %v1709_v24 = vpop.eup %1708 }
0x2298   :  { %v1382_v62 = vadd.f32 1.0, %v1709_v24  ;;  %v1623_v24 = vld [vmem:[%s2270_s8] ss:$0 sm:$0xff] }
0x229a   :  { %1710 = vrcp.f32 %v1382_v62  ;;  %v1394_v1 = vand.u32 2147483648, %v1382_v62  ;;  %v1392_v32 = vand.u32 2147483647, %v1382_v62  ;;  %vm1388_vm15 = vweird.f32 %v1382_v62 }
0x229c   :  { %v1395_v45 = vor.u32 1.1754944e-38, %v1394_v1  ;;  %vm1393_vm2 = vcmp.eq.f32.partialorder %v1392_v32, 8.507059e+37 }
0x22a0   :  { %v1711_v61 = vpop.eup %1710 }
0x22a1   :  { %v1384_v20 = vmul.f32 %v1711_v61, %v1382_v62  ;;  %vm1389_vm14 = vweird.f32 %v1711_v61 }
0x22a2   :  { %vm1390_vm1 = vmor %vm1388_vm15, %vm1389_vm14 }
0x22a3   :  { %v1385_v63 = vsub.f32 1.0, %v1384_v20 }
0x22a5   :  { %v1386_v2 = vmul.f32 %v1711_v61, %v1385_v63 }
0x22a7   :  { %v1387_v7 = vadd.f32 %v1711_v61, %v1386_v2 }
0x22a9   :  { %v1391_v60 = vsel %vm1390_vm1, %v1711_v61, %v1387_v7 }
0x22aa   :  { %v1396_v22 = vsel %vm1393_vm2, %v1395_v45, %v1391_v60 }
0x22ab   :  { %v1398_v3 = vmul.f32 2.0, %v1396_v22  ;;  %v1400_v9 = vmul.f32 %v1396_v22, %v1338_v4  ;;  %v1505_v4 = vld [vmem:[%s2269_s7 + $0x38] sm:$0xff] }
0x22ac   :  { %1521 = vmatpush.msra.mxu2 %v1505_v4 }
0x22ad   :  { %v1606_v47 = vadd.f32 -1.0, %v1398_v3 }
0x22ae   :  { %1522 = vmatpush.msra.mxu2 %v1504_v49 }
0x22af   :  { %1402 = vrot.lane.b32.xlu2 %v1606_v47, %s1830_s0 }
0x22b0   :  { %1523 = vmatpush.msra.mxu2 %v1503_v0 }
0x22b2   :  { %1524 = vmatpush.msra.mxu2 %v1502_v50 }
0x22b4   :  { %1525 = vmatpush.msra.mxu2 %v1501_v51 }
0x22b6   :  { %1526 = vmatpush.msra.mxu2 %v1500_v52 }
0x22b8   :  { %1527 = vmatpush.msra.mxu2 %v1499_v53 }
0x22ba   :  { %1528 = vmatpush.msra.mxu2 %v1498_v57 }
0x2309   :  { %v1403_v6 = vpop.permute.xlu2 %1402 }
0x230a   :  { %v1405_v8 = vmul.f32 %v1403_v6, %v1396_v22 }
0x230c   :  { %1407 = vrot.lane.b32.xlu0 %v1405_v8, %s1831_s1 }
0x237e   :  { %v1408_v10 = vpop.permute.xlu0 %1407 }
0x237f   :  { %v1410_v31 = vadd.f32 %v1408_v10, %v1400_v9 }
0x2381   :  { %1712 = vtanh.f32 %v1410_v31 }
0x2387   :  { %v1713_v33 = vpop.eup %1712 }
0x2388   :  { %1413 = vrot.lane.b32.xlu1 %v1713_v33, %s1830_s0 }
0x23fa   :  { %v1414_v12 = vpop.permute.xlu1 %1413 }
0x23fb   :  { %v1416_v13 = vmul.f32 %v1414_v12, %v1396_v22 }
0x23fd   :  { %1421 = vrot.lane.b32.xlu0 %v1416_v13, %s1830_s0  ;;  %1418 = vrot.lane.b32.xlu2 %v1416_v13, %s1831_s1 }
0x2457   :  { %v1419_v14 = vpop.permute.xlu2 %1418 }
0x246f   :  { %v1422_v15 = vpop.permute.xlu0 %1421 }
0x2470   :  { %v1424_v30 = vsel %vm86_vm11, %v1419_v14, %v1422_v15 }
0x2471   :  { %v1425_v16 = vmul.f32 %v1424_v30, %v1968_v18 }
0x2473   :  { %1607 = vmatmul.msk.f32.vlgmr.msra.gmra.mxu1 %vm263_vm12, %v1425_v16 }
0x24f0   :  { %v1446_v35 = vpop.f32.mrf.mxu1 }
0x24f1   :  { %v1449_v17 = vadd.f32 %v1446_v35, %v2133_v21 }
0x24f3   :  { %v1450_v19 = vmul.f32 %v1449_v17, %v1929_v27 }
0x24f5   :  { %v1608_v5 = vmul.f32 -1.442695, %v1450_v19 }
0x24f7   :  { %1714 = vpow2.f32 %v1608_v5 }
0x24fd   :  { %v1715_v23 = vpop.eup %1714 }
0x24fe   :  { %v1454_v25 = vadd.f32 1.0, %v1715_v23 }
0x2500   :  { %1716 = vrcp.f32 %v1454_v25  ;;  %v1466_v28 = vand.u32 2147483648, %v1454_v25  ;;  %v1464_v34 = vand.u32 2147483647, %v1454_v25  ;;  %vm1460_vm3 = vweird.f32 %v1454_v25 }
0x2502   :  { %v1467_v36 = vor.u32 1.1754944e-38, %v1466_v28  ;;  %vm1465_vm5 = vcmp.eq.f32.partialorder %v1464_v34, 8.507059e+37 }
0x2506   :  { %v1717_v26 = vpop.eup %1716 }
0x2507   :  { %v1456_v44 = vmul.f32 %v1717_v26, %v1454_v25  ;;  %vm1461_vm0 = vweird.f32 %v1717_v26 }
0x2508   :  { %vm1462_vm4 = vmor %vm1460_vm3, %vm1461_vm0 }
0x2509   :  { %v1457_v54 = vsub.f32 1.0, %v1456_v44 }
0x250b   :  { %v1458_v29 = vmul.f32 %v1717_v26, %v1457_v54 }
0x250d   :  { %v1459_v18 = vadd.f32 %v1717_v26, %v1458_v29 }
0x250f   :  { %v1463_v38 = vsel %vm1462_vm4, %v1717_v26, %v1459_v18 }
0x2510   :  { %v1468_v21 = vsel %vm1465_vm5, %v1467_v36, %v1463_v38 }
0x2511   :  { %v1470_v27 = vmul.f32 2.0, %v1468_v21  ;;  %v1472_v42 = vmul.f32 %v1468_v21, %v1410_v31 }
0x2513   :  { %v1609_v37 = vadd.f32 -1.0, %v1470_v27 }
0x2515   :  { %1474 = vrot.lane.b32.xlu1 %v1609_v37, %s1830_s0 }
0x2587   :  { %v1475_v11 = vpop.permute.xlu1 %1474 }
0x2588   :  { %v1477_v39 = vmul.f32 %v1475_v11, %v1468_v21 }
0x258a   :  { %1479 = vrot.lane.b32.xlu2 %v1477_v39, %s1831_s1 }
0x2592   :  { %1494 = vrot.lane.b32.xlu2 %v1493_v40, %s1830_s0 }
0x25e4   :  { %v1480_v46 = vpop.permute.xlu2 %1479 }
0x25e5   :  { %v1482_v48 = vadd.f32 %v1480_v46, %v1472_v42 }
0x25e7   :  { %1718 = vtanh.f32 %v1482_v48 }
0x25ec   :  { %v1495_v58 = vpop.permute.xlu2 %1494 }
0x25ed   :  { %v1719_v41 = vpop.eup %1718 }
0x25ee   :  { %1485 = vrot.lane.b32.xlu0 %v1719_v41, %s1830_s0 }
0x2660   :  { %v1486_v56 = vpop.permute.xlu0 %1485 }
0x2661   :  { %v1488_v43 = vmul.f32 %v1486_v56, %v1468_v21 }
0x2663   :  { %1490 = vrot.lane.b32.xlu1 %v1488_v43, %s1831_s1 }
0x26d5   :  { %v1491_v55 = vpop.permute.xlu1 %1490 }
0x26d6   :  { %v1497_v59 = vsel %vm86_vm11, %v1491_v55, %v1495_v58 }
0x26d7   :  { %1610 = vmatmul.msk.f32.vlgmr.msra.gmra.mxu2 %vm263_vm12, %v1497_v59 }
0x275a   :  { %v1530_v62 = vpop.f32.mrf.mxu2 }
0x275b   :  { %v1531_v61 = vadd.f32 %v1623_v24, %v1530_v62 }
0x275d   :  { %1534 = vst.msk [vmem:[#allocation8] sm:$0x3] %vm1533_vm6, %v1531_v61 }
0x275e   :  { %1545 = dma.vmem_to_hbm [thread:$0]  %s1541_s21, 32, %s1543_s23, [#allocation4]  }
0x275f   :  { %1820 = dma.done.wait [#allocation4], 32  }
0x2760   :  { %1821 = vsyncadd [#allocation4], 4294967264 }
0x2761   :  { %1550 = vsyncpa [#allocation3], 1 }
0x2762   :  { %1551 = vsyncpa [#allocation6], 1 }
0x2763   :  { %1552 = vsyncpa [#allocation4], 1 }

</bundles_post_ra>
